<compile_context>
chip_gen: v7x
topology: tpu7x:2x2x1
jax: 0.10.0
libtpu: 0.0.40
codegen_flags: <defaults>
</compile_context>

<pallas_src>
import functools
import math

import numpy as np
import jax
import jax.numpy as jnp
from jax.experimental import pallas as pl
from jax.experimental.pallas import tpu as pltpu


# --------------------------------------------------------------------------
# helpers
# --------------------------------------------------------------------------
def _round_up(x, m):
    return (x + m - 1) // m * m


def _vmem_budget_bytes():
    """Per-generation scoped-VMEM budget (v5e/v6e: ~96 MiB, v7x: ~48 MiB)."""
    cap = 64 << 20
    try:
        cap = int(pltpu.get_tpu_info().vmem_capacity_bytes)
    except Exception:
        pass
    return min((cap * 3) // 4, 96 << 20)


def _best_divisor(n, cap):
    """Largest divisor of n that is <= cap (n itself when n <= cap)."""
    if n <= cap:
        return n
    for d in range(cap, 0, -1):
        if n % d == 0:
            return d
    return n


# --------------------------------------------------------------------------
# Fused (LayerNorm?) -> Linear -> (+bias) -> (activation?) -> (+residual?)
# --------------------------------------------------------------------------
def _fused_linear_kernel(*refs, has_ln, has_residual, activation, eps):
    idx = 0
    x_ref = refs[idx]; idx += 1
    if has_ln:
        g_ref, bln_ref = refs[idx], refs[idx + 1]; idx += 2
    w_ref, b_ref = refs[idx], refs[idx + 1]; idx += 2
    if has_residual:
        r_ref = refs[idx]; idx += 1
    o_ref = refs[idx]

    x = x_ref[...]
    if has_ln:
        xf = x.astype(jnp.float32)
        mean = jnp.mean(xf, axis=-1, keepdims=True)
        var = jnp.mean((xf - mean) ** 2, axis=-1, keepdims=True)
        x = (xf - mean) * jax.lax.rsqrt(var + eps)
        x = x * g_ref[...].astype(jnp.float32) + bln_ref[...].astype(jnp.float32)
    # feed the MXU in the weight dtype (bf16 weights -> bf16 MXU), accumulate f32
    x = x.astype(w_ref.dtype)
    y = jnp.dot(x, w_ref[...], preferred_element_type=jnp.float32)
    y = y + b_ref[...].astype(jnp.float32)
    if activation == "gelu":
        # exact GELU (matches torch.nn.GELU(approximate='none'))
        y = 0.5 * y * (1.0 + jax.lax.erf(y * 0.7071067811865476))
    elif activation == "relu":
        y = jnp.maximum(y, 0.0)
    elif activation == "elu":
        y = jnp.where(y > 0.0, y, jnp.exp(y) - 1.0)
    if has_residual:
        y = y + r_ref[...].astype(jnp.float32)
    o_ref[...] = y.astype(o_ref.dtype)


def fused_linear(x2d, w, b, *, ln=None, residual=None, activation=None,
                 eps=1e-5, out_dtype=None):
    """x2d: (N, Din); w: (Din, Dout); b: (Dout,); ln=(gamma, beta) over Din;
    residual: (N, Dout) added after bias/activation."""
    n, d_in = x2d.shape
    d_out = w.shape[1]
    out_dtype = out_dtype if out_dtype is not None else x2d.dtype
    budget = _vmem_budget_bytes()

    # ---- tile selection (ragged edges handled by Pallas; no host-side pad) --
    max_tile_m = 512 if budget >= (80 << 20) else 256
    tile_m = _round_up(pl.cdiv(n, pl.cdiv(n, max_tile_m)), 8)
    tile_n = min(d_out, 512)

    def footprint(tm, tn):
        xb = tm * d_in * np.dtype(x2d.dtype).itemsize
        wb = d_in * tn * np.dtype(w.dtype).itemsize
        ob = tm * tn * np.dtype(out_dtype).itemsize
        rb = tm * tn * np.dtype(residual.dtype).itemsize if residual is not None else 0
        return 2 * (xb + wb + ob + rb)          # double-buffered pipeline

    while tile_n > 128 and footprint(tile_m, tile_n) > (budget * 3) // 4:
        tile_n = max(128, tile_n // 2)
    while tile_m > 64 and footprint(tile_m, tile_n) > (budget * 3) // 4:
        tile_m = max(64, _round_up(tile_m // 2, 8))
    # TODO(synk): add a K (d_in) reduction grid axis + f32 VMEM accumulator for
    # very large d_in where a full-K row/weight block no longer fits VMEM.

    grid_m = pl.cdiv(n, tile_m)
    grid_n = pl.cdiv(d_out, tile_n)

    # Loop-order choice: keep the operand whose redundant re-streaming would be
    # larger resident (N-outer holds the weight block resident -> the weight is
    # streamed once instead of once per row tile).
    x_bytes = n * d_in * np.dtype(x2d.dtype).itemsize
    w_bytes = d_in * d_out * np.dtype(w.dtype).itemsize
    n_outer = x_bytes * (grid_n - 1) <= w_bytes * (grid_m - 1)

    if n_outer:
        grid = (grid_n, grid_m)
        x_map = lambda j, i: (i, 0)
        w_map = lambda j, i: (0, j)
        b_map = lambda j, i: (0, j)
        io_map = lambda j, i: (i, j)
    else:
        grid = (grid_m, grid_n)
        x_map = lambda i, j: (i, 0)
        w_map = lambda i, j: (0, j)
        b_map = lambda i, j: (0, j)
        io_map = lambda i, j: (i, j)
    ln_map = lambda *_: (0, 0)

    in_specs = [pl.BlockSpec((tile_m, d_in), x_map)]
    args = [x2d]
    if ln is not None:
        g, bln = ln
        in_specs += [pl.BlockSpec((1, d_in), ln_map), pl.BlockSpec((1, d_in), ln_map)]
        args += [g.reshape(1, d_in), bln.reshape(1, d_in)]
    in_specs += [pl.BlockSpec((d_in, tile_n), w_map), pl.BlockSpec((1, tile_n), b_map)]
    args += [w, b.reshape(1, d_out)]
    if residual is not None:
        in_specs += [pl.BlockSpec((tile_m, tile_n), io_map)]
        args += [residual]

    kern = functools.partial(_fused_linear_kernel, has_ln=ln is not None,
                             has_residual=residual is not None,
                             activation=activation, eps=eps)

    return pl.pallas_call(
        kern,
        out_shape=jax.ShapeDtypeStruct((n, d_out), out_dtype),
        grid_spec=pltpu.PrefetchScalarGridSpec(
            num_scalar_prefetch=0,
            grid=grid,
            in_specs=in_specs,
            out_specs=pl.BlockSpec((tile_m, tile_n), io_map)),
        compiler_params=pltpu.CompilerParams(
            dimension_semantics=("parallel", "parallel"),
            vmem_limit_bytes=budget),
    )(*args)


# --------------------------------------------------------------------------
# Flash-style multi-head attention.
# q/k/v are read directly out of the fused projection layout (L, B, S, H, hd)
# via BlockSpec selectors; grid = (B, Lq-blocks, Lk-blocks), online softmax
# over the (arbitrary) KV axis with f32 m/l/acc scratch.
# --------------------------------------------------------------------------
def _mha_flash_kernel(*refs, scale, has_mask):
    if has_mask:
        kvlen_ref = refs[0]
        refs = refs[1:]
    q_ref, k_ref, v_ref, o_ref, qh_sc, m_sc, l_sc, acc_sc = refs

    b = pl.program_id(0)
    ki = pl.program_id(2)
    kv_tile = k_ref.shape[0]

    @pl.when(ki == 0)
    def _():
        # q relayout to (H, q_tile, hd) once per (b, q-block); done in VMEM so
        # no HBM transpose pass is ever needed on the activations.
        qh_sc[...] = jnp.swapaxes(q_ref[...], 0, 1).astype(qh_sc.dtype)
        m_sc[...] = jnp.full(m_sc.shape, -jnp.inf, jnp.float32)
        l_sc[...] = jnp.zeros(l_sc.shape, jnp.float32)
        acc_sc[...] = jnp.zeros(acc_sc.shape, jnp.float32)

    k = jnp.swapaxes(k_ref[...], 0, 1)           # (H, kv_tile, hd)
    v = jnp.swapaxes(v_ref[...], 0, 1)           # (H, kv_tile, hd)

    # batched QK^T contracting the last dims (no materialized k.T)
    s = jax.lax.dot_general(
        qh_sc[...], k,
        dimension_numbers=(((2,), (2,)), ((0,), (0,))),
        preferred_element_type=jnp.float32) * scale          # (H, q_tile, kv_tile)

    if has_mask:
        j = ki * kv_tile + jax.lax.broadcasted_iota(jnp.int32, (1, 1, kv_tile), 2)
        s = jnp.where(j >= kvlen_ref[b], jnp.float32(-1e30), s)

    m_prev = m_sc[...]
    m_new = jnp.maximum(m_prev, jnp.max(s, axis=-1, keepdims=True))
    alpha = jnp.exp(m_prev - m_new)
    p = jnp.exp(s - m_new)
    l_sc[...] = alpha * l_sc[...] + jnp.sum(p, axis=-1, keepdims=True)
    acc_sc[...] = alpha * acc_sc[...] + jax.lax.dot_general(
        p.astype(v.dtype), v,
        dimension_numbers=(((2,), (1,)), ((0,), (0,))),
        preferred_element_type=jnp.float32)
    m_sc[...] = m_new

    @pl.when(ki == pl.num_programs(2) - 1)
    def _():
        o = acc_sc[...] * pl.reciprocal(l_sc[...], approx=True)
        o_ref[...] = jnp.swapaxes(o, 0, 1).astype(o_ref.dtype)


def multihead_attention(q_src, k_src, v_src, kv_len, *, sels, scale, out_dtype):
    """q_src: (Lq, B, Sq, H, hd); k_src/v_src: (Lk, B, S, H, hd); sels pick the
    q/k/v slice along the S axis.  kv_len: (B,) int32 or None."""
    Lq, B, _, H, hd = q_src.shape
    Lk = k_src.shape[0]
    q_sel, k_sel, v_sel = sels
    has_mask = kv_len is not None
    budget = _vmem_budget_bytes()

    q_tile = min(Lq, 256)
    kv_cap = 512
    # keep the (H, q_tile, kv_tile) f32 score/prob temporaries well inside VMEM
    while kv_cap > 128 and 4 * H * q_tile * kv_cap * 4 > budget // 2:
        kv_cap //= 2
    kv_tile = _best_divisor(Lk, kv_cap)
    grid = (B, pl.cdiv(Lq, q_tile), Lk // kv_tile)

    q_map = lambda b, qi, ki, *_: (qi, b, q_sel, 0, 0)
    k_map = lambda b, qi, ki, *_: (ki, b, k_sel, 0, 0)
    v_map = lambda b, qi, ki, *_: (ki, b, v_sel, 0, 0)
    o_map = lambda b, qi, ki, *_: (qi, b, 0, 0)

    in_specs = [
        pl.BlockSpec((q_tile, None, None, H, hd), q_map),
        pl.BlockSpec((kv_tile, None, None, H, hd), k_map),
        pl.BlockSpec((kv_tile, None, None, H, hd), v_map),
    ]
    args = [q_src, k_src, v_src]
    if has_mask:
        args = [kv_len.astype(jnp.int32)] + args

    return pl.pallas_call(
        functools.partial(_mha_flash_kernel, scale=scale, has_mask=has_mask),
        out_shape=jax.ShapeDtypeStruct((Lq, B, H, hd), out_dtype),
        grid_spec=pltpu.PrefetchScalarGridSpec(
            num_scalar_prefetch=1 if has_mask else 0,
            grid=grid,
            in_specs=in_specs,
            out_specs=pl.BlockSpec((q_tile, None, H, hd), o_map),
            scratch_shapes=[
                pltpu.VMEM((H, q_tile, hd), q_src.dtype),   # q relayout cache
                pltpu.VMEM((H, q_tile, 1), jnp.float32),    # running max
                pltpu.VMEM((H, q_tile, 1), jnp.float32),    # running denom
                pltpu.VMEM((H, q_tile, hd), jnp.float32),   # output accumulator
            ]),
        compiler_params=pltpu.CompilerParams(
            dimension_semantics=("parallel", "parallel", "arbitrary"),
            vmem_limit_bytes=budget),
    )(*args)


# --------------------------------------------------------------------------
# Full forward pass (TransformerEncoderLayer_QKV_v1.forward, eval mode)
# --------------------------------------------------------------------------
def transformer_encoder_layer_qkv(params, x_q, x_k=None, x_v=None, kv_len=None,
                                  *, embed_dim, num_heads,
                                  compute_dtype=jnp.bfloat16, activation="gelu"):
    """x_q: (Lq, B, E); x_k/x_v: (Lk, B, E) or None; kv_len: (B,) int or None.
    embed_dim / num_heads / compute_dtype must be static.
    # TODO(synk): 'prelu' activation variant needs a learned parameter."""
    E, H = embed_dim, num_heads
    hd = E // H
    scale = 1.0 / math.sqrt(hd)
    Lq, B, _ = x_q.shape
    in_dtype = x_q.dtype
    cdt = compute_dtype

    ln0 = (params["ln0_g"], params["ln0_b"])
    wqkv = params["wqkv"].astype(cdt)       # (E, 3E), columns [q | k | v]
    bqkv = params["bqkv"]                   # biases stay f32 (added in f32 in-kernel)

    xq2 = x_q.reshape(Lq * B, E)

    if x_k is None:
        # self-attention: single fused LN0 + QKV projection (LN0 computed once)
        qkv = fused_linear(xq2, wqkv, bqkv, ln=ln0, out_dtype=cdt)     # (Lq*B, 3E)
        src = qkv.reshape(Lq, B, 3, H, hd)                             # free reshape
        q_src = k_src = v_src = src
        sels = (0, 1, 2)
    else:
        Lk = x_k.shape[0]
        xk2 = x_k.reshape(Lk * B, E)
        q = fused_linear(xq2, wqkv[:, :E], bqkv[:E], ln=ln0, out_dtype=cdt)
        q_src = q.reshape(Lq, B, 1, H, hd)
        if x_v is None:
            # key = value = LN0(x_k): fused K+V projection (E x 2E)
            kv = fused_linear(xk2, wqkv[:, E:], bqkv[E:], ln=ln0, out_dtype=cdt)
            k_src = v_src = kv.reshape(Lk, B, 2, H, hd)
            sels = (0, 0, 1)
        else:
            k = fused_linear(xk2, wqkv[:, E:2 * E], bqkv[E:2 * E],
                             ln=ln0, out_dtype=cdt)
            v = fused_linear(x_v.reshape(Lk * B, E), wqkv[:, 2 * E:], bqkv[2 * E:],
                             ln=ln0, out_dtype=cdt)
            k_src = k.reshape(Lk, B, 1, H, hd)
            v_src = v.reshape(Lk, B, 1, H, hd)
            sels = (0, 0, 0)

    attn = multihead_attention(q_src, k_src, v_src, kv_len, sels=sels,
                               scale=scale, out_dtype=cdt)             # (Lq,B,H,hd)
    attn2 = attn.reshape(Lq * B, E)

    # out-projection with the first residual fused in (dropout = identity)
    x = fused_linear(attn2, params["wo"].astype(cdt), params["bo"],
                     residual=xq2, out_dtype=cdt)

    # FFN block: LN1 fused into fc1 (+activation); second residual fused into fc2
    ln1 = (params["ln1_g"], params["ln1_b"])
    h = fused_linear(x, params["w1"].astype(cdt), params["b1"],
                     ln=ln1, activation=activation, out_dtype=cdt)
    out = fused_linear(h, params["w2"].astype(cdt), params["b2"],
                       residual=x, out_dtype=in_dtype)
    return out.reshape(Lq, B, E)


# --------------------------------------------------------------------------
# Deterministic parameter init (xavier-uniform weights, zero biases, LN = 1/0)
# --------------------------------------------------------------------------
def init_params(key, embed_dim):
    E = embed_dim

    def xavier(k, shape):
        fan_in, fan_out = shape
        lim = math.sqrt(6.0 / (fan_in + fan_out))
        return jax.random.uniform(k, shape, jnp.float32, -lim, lim)

    ks = jax.random.split(key, 6)
    wq, wk, wv = xavier(ks[0], (E, E)), xavier(ks[1], (E, E)), xavier(ks[2], (E, E))
    return {
        # fused in-projection, columns ordered [q | k | v], stored (Din, Dout)=torch_w.T
        "wqkv": jnp.concatenate([wq, wk, wv], axis=1),
        "bqkv": jnp.zeros((3 * E,), jnp.float32),
        "wo": xavier(ks[3], (E, E)), "bo": jnp.zeros((E,), jnp.float32),
        "w1": xavier(ks[4], (E, 4 * E)), "b1": jnp.zeros((4 * E,), jnp.float32),
        "w2": xavier(ks[5], (4 * E, E)), "b2": jnp.zeros((E,), jnp.float32),
        "ln0_g": jnp.ones((E,), jnp.float32), "ln0_b": jnp.zeros((E,), jnp.float32),
        "ln1_g": jnp.ones((E,), jnp.float32), "ln1_b": jnp.zeros((E,), jnp.float32),
    }


# --------------------------------------------------------------------------
# Pure-JAX reference (correctness sanity check)
# --------------------------------------------------------------------------
def reference_forward(params, x_q, x_k=None, x_v=None, kv_len=None,
                      *, embed_dim, num_heads):
    E, H = embed_dim, num_heads
    hd = E // H
    Lq, B, _ = x_q.shape

    def ln(i, t):
        m = jnp.mean(t, -1, keepdims=True)
        v = jnp.mean((t - m) ** 2, -1, keepdims=True)
        return (t - m) * jax.lax.rsqrt(v + 1e-5) * params[f"ln{i}_g"] + params[f"ln{i}_b"]

    wq, wk, wv = (params["wqkv"][:, :E], params["wqkv"][:, E:2 * E],
                  params["wqkv"][:, 2 * E:])
    bq, bk, bv = (params["bqkv"][:E], params["bqkv"][E:2 * E], params["bqkv"][2 * E:])

    res = x_q
    qn = ln(0, x_q)
    kn = qn if x_k is None else ln(0, x_k)
    vn = kn if (x_k is None or x_v is None) else ln(0, x_v)
    Lk = kn.shape[0]
    q = qn @ wq + bq
    k = kn @ wk + bk
    v = vn @ wv + bv
    to_bh = lambda t, L: t.reshape(L, B, H, hd).transpose(1, 2, 0, 3)
    qb, kb, vb = to_bh(q, Lq), to_bh(k, Lk), to_bh(v, Lk)
    s = jnp.einsum("bhqd,bhkd->bhqk", qb, kb) / math.sqrt(hd)
    if kv_len is not None:
        pad = jnp.arange(Lk)[None, :] >= kv_len[:, None]
        s = s + jnp.where(pad, -1e30, 0.0)[:, None, None, :]
    p = jax.nn.softmax(s, axis=-1)
    a = jnp.einsum("bhqk,bhkd->bhqd", p, vb).transpose(2, 0, 1, 3).reshape(Lq, B, E)
    a = a @ params["wo"] + params["bo"]
    x = res + a
    res = x
    h = ln(1, x)
    h = h @ params["w1"] + params["b1"]
    h = 0.5 * h * (1.0 + jax.lax.erf(h / jnp.sqrt(2.0)))
    h = h @ params["w2"] + params["b2"]
    return res + h


# --------------------------------------------------------------------------
if __name__ == "__main__":
    seq_len, batch, embed_dim, num_heads = 8, 2, 32, 4

    key = jax.random.PRNGKey(0)
    k_param, k_xq, k_xk, k_xv = jax.random.split(key, 4)
    params = init_params(k_param, embed_dim)

    x_q = jax.random.normal(k_xq, (seq_len, batch, embed_dim), jnp.float32)
    x_k = jax.random.normal(k_xk, (seq_len, batch, embed_dim), jnp.float32)
    x_v = jax.random.normal(k_xv, (seq_len, batch, embed_dim), jnp.float32)
    kv_len = jnp.array([5, 8], jnp.int32)

    fwd_f32 = jax.jit(functools.partial(
        transformer_encoder_layer_qkv, embed_dim=embed_dim, num_heads=num_heads,
        compute_dtype=jnp.float32))
    fwd_bf16 = jax.jit(functools.partial(
        transformer_encoder_layer_qkv, embed_dim=embed_dim, num_heads=num_heads,
        compute_dtype=jnp.bfloat16))

    # 1) self-attention path (fused QKV projection, no mask), f32 compute
    out_self = fwd_f32(params, x_q)
    jax.block_until_ready(out_self)
    ref_self = reference_forward(params, x_q, embed_dim=embed_dim, num_heads=num_heads)
    assert out_self.shape == (seq_len, batch, embed_dim)
    assert float(jnp.max(jnp.abs(out_self - ref_self))) < 5e-3

    # 2) cross-attention with explicit K/V and key-padding mask, f32 compute
    out_cross = fwd_f32(params, x_q, x_k, x_v, kv_len)
    jax.block_until_ready(out_cross)
    ref_cross = reference_forward(params, x_q, x_k, x_v, kv_len,
                                  embed_dim=embed_dim, num_heads=num_heads)
    assert out_cross.shape == (seq_len, batch, embed_dim)
    assert float(jnp.max(jnp.abs(out_cross - ref_cross))) < 5e-3

    # 3) cross-attention with fused K=V projection + mask on the bf16 fast path
    out_kv = fwd_bf16(params, x_q, x_k, None, kv_len)
    jax.block_until_ready(out_kv)
    ref_kv = reference_forward(params, x_q, x_k, None, kv_len,
                               embed_dim=embed_dim, num_heads=num_heads)
    assert out_kv.shape == (seq_len, batch, embed_dim)
    assert bool(jnp.all(jnp.isfinite(out_kv)))
    # loose bound: bf16 weights/activations vs the f32 reference
    assert float(jnp.max(jnp.abs(out_kv.astype(jnp.float32) - ref_kv))) < 3e-1

    print("KERNEL_OK")
</pallas_src>

<mosaic_0001>
module attributes {stable_mosaic.version = 11 : i64} {
  func.func @_fused_linear_kernel(%arg0: i32, %arg1: i32, %arg2: memref<16x32xf32, #tpu.memory_space<vmem>>, %arg3: memref<1x32xf32, #tpu.memory_space<vmem>>, %arg4: memref<1x32xf32, #tpu.memory_space<vmem>>, %arg5: memref<32x96xf32, #tpu.memory_space<vmem>>, %arg6: memref<1x96xf32, #tpu.memory_space<vmem>>, %arg7: memref<16x96xf32, #tpu.memory_space<vmem>>) attributes {dimension_semantics = [#tpu.dimension_semantics<parallel>, #tpu.dimension_semantics<parallel>], iteration_bounds = array<i64: 1, 1>, scalar_prefetch = 0 : i64, scratch_operands = 0 : i64, tpu.core_type = #tpu.core_type<tc>, window_params = [{transform_indices = @transform_0, window_bounds = array<i64: 16, 32>}, {pipeline_mode = #tpu.pipeline_mode<synchronous>, transform_indices = @transform_1, window_bounds = array<i64: 1, 32>}, {pipeline_mode = #tpu.pipeline_mode<synchronous>, transform_indices = @transform_2, window_bounds = array<i64: 1, 32>}, {transform_indices = @transform_3, window_bounds = array<i64: 32, 96>}, {transform_indices = @transform_4, window_bounds = array<i64: 1, 96>}, {transform_indices = @transform_5, window_bounds = array<i64: 16, 96>}]} {
    %c0 = arith.constant 0 : index
    %c0_0 = arith.constant 0 : index
    %0 = vector.load %arg2[%c0, %c0_0] : memref<16x32xf32, #tpu.memory_space<vmem>>, vector<16x32xf32>
    %cst = arith.constant dense<0.000000e+00> : vector<16xf32>
    %1 = vector.multi_reduction <add>, %0, %cst [1] : vector<16x32xf32> to vector<16xf32>
    %2 = vector.shape_cast %1 : vector<16xf32> to vector<16x1xf32>
    %cst_1 = arith.constant 3.200000e+01 : f32
    %3 = vector.broadcast %cst_1 : f32 to vector<16x1xf32>
    %4 = arith.divf %2, %3 : vector<16x1xf32>
    %5 = vector.broadcast %4 : vector<16x1xf32> to vector<16x32xf32>
    %6 = arith.subf %0, %5 : vector<16x32xf32>
    %7 = arith.mulf %6, %6 : vector<16x32xf32>
    %cst_2 = arith.constant dense<0.000000e+00> : vector<16xf32>
    %8 = vector.multi_reduction <add>, %7, %cst_2 [1] : vector<16x32xf32> to vector<16xf32>
    %9 = vector.shape_cast %8 : vector<16xf32> to vector<16x1xf32>
    %cst_3 = arith.constant 3.200000e+01 : f32
    %10 = vector.broadcast %cst_3 : f32 to vector<16x1xf32>
    %11 = arith.divf %9, %10 : vector<16x1xf32>
    %12 = vector.broadcast %4 : vector<16x1xf32> to vector<16x32xf32>
    %13 = arith.subf %0, %12 : vector<16x32xf32>
    %cst_4 = arith.constant 9.99999974E-6 : f32
    %14 = vector.broadcast %cst_4 : f32 to vector<16x1xf32>
    %15 = arith.addf %11, %14 : vector<16x1xf32>
    %16 = math.rsqrt %15 : vector<16x1xf32>
    %17 = vector.broadcast %16 : vector<16x1xf32> to vector<16x32xf32>
    %18 = arith.mulf %13, %17 : vector<16x32xf32>
    %c0_5 = arith.constant 0 : index
    %c0_6 = arith.constant 0 : index
    %19 = vector.load %arg3[%c0_5, %c0_6] : memref<1x32xf32, #tpu.memory_space<vmem>>, vector<1x32xf32>
    %20 = vector.broadcast %19 : vector<1x32xf32> to vector<16x32xf32>
    %21 = arith.mulf %18, %20 : vector<16x32xf32>
    %c0_7 = arith.constant 0 : index
    %c0_8 = arith.constant 0 : index
    %22 = vector.load %arg4[%c0_7, %c0_8] : memref<1x32xf32, #tpu.memory_space<vmem>>, vector<1x32xf32>
    %23 = vector.broadcast %22 : vector<1x32xf32> to vector<16x32xf32>
    %24 = arith.addf %21, %23 : vector<16x32xf32>
    %c0_9 = arith.constant 0 : index
    %c0_10 = arith.constant 0 : index
    %25 = vector.load %arg5[%c0_9, %c0_10] : memref<32x96xf32, #tpu.memory_space<vmem>>, vector<32x96xf32>
    %cst_11 = arith.constant dense<0.000000e+00> : vector<16x96xf32>
    %26 = tpu.matmul %24, %25, %cst_11 {dimension_numbers = #tpu.dot_dimension_numbers<[1], [0], [0], [1], [0, 0, 1, 1], [], []>} : vector<16x32xf32>, vector<32x96xf32>, vector<16x96xf32> -> vector<16x96xf32>
    %c0_12 = arith.constant 0 : index
    %c0_13 = arith.constant 0 : index
    %27 = vector.load %arg6[%c0_12, %c0_13] : memref<1x96xf32, #tpu.memory_space<vmem>>, vector<1x96xf32>
    %28 = vector.broadcast %27 : vector<1x96xf32> to vector<16x96xf32>
    %29 = arith.addf %26, %28 : vector<16x96xf32>
    %c0_14 = arith.constant 0 : index
    %c0_15 = arith.constant 0 : index
    %30 = vector.load %arg7[%c0_14, %c0_15] : memref<16x96xf32, #tpu.memory_space<vmem>>, vector<16x96xf32>
    tpu.vector_store %arg7[%c0_14, %c0_15], %29 {strides = array<i32>} : memref<16x96xf32, #tpu.memory_space<vmem>>, vector<16x96xf32>,
    return
  }
  func.func @transform_0(%arg0: i32, %arg1: i32) -> (i32, i32) {
    %c0_i32 = arith.constant 0 : i32
    %c0_i32_0 = arith.constant 0 : i32
    return %arg1, %c0_i32 : i32, i32
  }
  func.func @transform_1(%arg0: i32, %arg1: i32) -> (i32, i32) {
    %c0_i32 = arith.constant 0 : i32
    %c0_i32_0 = arith.constant 0 : i32
    %c0_i32_1 = arith.constant 0 : i32
    return %c0_i32, %c0_i32_0 : i32, i32
  }
  func.func @transform_2(%arg0: i32, %arg1: i32) -> (i32, i32) {
    %c0_i32 = arith.constant 0 : i32
    %c0_i32_0 = arith.constant 0 : i32
    %c0_i32_1 = arith.constant 0 : i32
    return %c0_i32, %c0_i32_0 : i32, i32
  }
  func.func @transform_3(%arg0: i32, %arg1: i32) -> (i32, i32) {
    %c0_i32 = arith.constant 0 : i32
    %c0_i32_0 = arith.constant 0 : i32
    return %c0_i32, %arg0 : i32, i32
  }
  func.func @transform_4(%arg0: i32, %arg1: i32) -> (i32, i32) {
    %c0_i32 = arith.constant 0 : i32
    %c0_i32_0 = arith.constant 0 : i32
    return %c0_i32, %arg0 : i32, i32
  }
  func.func @transform_5(%arg0: i32, %arg1: i32) -> (i32, i32) {
    %c0_i32 = arith.constant 0 : i32
    return %arg1, %arg0 : i32, i32
  }
}

module attributes {stable_mosaic.version = 11 : i64} {
  func.func @_mha_flash_kernel(%arg0: i32, %arg1: i32, %arg2: i32, %arg3: memref<8x1x1x4x8xf32, #tpu.memory_space<vmem>>, %arg4: memref<8x1x1x4x8xf32, #tpu.memory_space<vmem>>, %arg5: memref<8x1x1x4x8xf32, #tpu.memory_space<vmem>>, %arg6: memref<8x1x4x8xf32, #tpu.memory_space<vmem>>, %arg7: memref<4x8x8xf32, #tpu.memory_space<vmem>>, %arg8: memref<4x8x1xf32, #tpu.memory_space<vmem>>, %arg9: memref<4x8x1xf32, #tpu.memory_space<vmem>>, %arg10: memref<4x8x8xf32, #tpu.memory_space<vmem>>) attributes {dimension_semantics = [#tpu.dimension_semantics<parallel>, #tpu.dimension_semantics<parallel>, #tpu.dimension_semantics<arbitrary>], iteration_bounds = array<i64: 2, 1, 1>, scalar_prefetch = 0 : i64, scratch_operands = 4 : i64, tpu.core_type = #tpu.core_type<tc>, window_params = [{transform_indices = @transform_0, window_bounds = array<i64: 8, 1, 1, 4, 8>}, {transform_indices = @transform_1, window_bounds = array<i64: 8, 1, 1, 4, 8>}, {transform_indices = @transform_2, window_bounds = array<i64: 8, 1, 1, 4, 8>}, {transform_indices = @transform_3, window_bounds = array<i64: 8, 1, 4, 8>}]} {
    %c0_i32 = arith.constant 0 : i32
    %0 = arith.cmpi eq, %arg2, %c0_i32 : i32
    %1 = arith.extui %0 : i1 to i32
    %c0_i32_0 = arith.constant 0 : i32
    %2 = arith.cmpi ne, %1, %c0_i32_0 : i32
    scf.if %2 {
      %c0_37 = arith.constant 0 : index
      %c0_38 = arith.constant 0 : index
      %c0_39 = arith.constant 0 : index
      %c0_40 = arith.constant 0 : index
      %c0_41 = arith.constant 0 : index
      %38 = vector.load %arg3[%c0_37, %c0_38, %c0_39, %c0_40, %c0_41] : memref<8x1x1x4x8xf32, #tpu.memory_space<vmem>>, vector<8x1x1x4x8xf32>
      %39 = vector.shape_cast %38 : vector<8x1x1x4x8xf32> to vector<8x4x8xf32>
      %40 = tpu.transpose %39, [1, 0, 2] : vector<8x4x8xf32> -> vector<4x8x8xf32>
      %c0_42 = arith.constant 0 : index
      %c0_43 = arith.constant 0 : index
      %c0_44 = arith.constant 0 : index
      %41 = vector.load %arg7[%c0_42, %c0_43, %c0_44] : memref<4x8x8xf32, #tpu.memory_space<vmem>>, vector<4x8x8xf32>
      tpu.vector_store %arg7[%c0_42, %c0_43, %c0_44], %40 {strides = array<i32>} : memref<4x8x8xf32, #tpu.memory_space<vmem>>, vector<4x8x8xf32>,
      %cst_45 = arith.constant 0xFF800000 : f32
      %42 = vector.broadcast %cst_45 : f32 to vector<4x8x1xf32>
      %c0_46 = arith.constant 0 : index
      %c0_47 = arith.constant 0 : index
      %c0_48 = arith.constant 0 : index
      %43 = vector.load %arg8[%c0_46, %c0_47, %c0_48] : memref<4x8x1xf32, #tpu.memory_space<vmem>>, vector<4x8x1xf32>
      tpu.vector_store %arg8[%c0_46, %c0_47, %c0_48], %42 {strides = array<i32>} : memref<4x8x1xf32, #tpu.memory_space<vmem>>, vector<4x8x1xf32>,
      %cst_49 = arith.constant 0.000000e+00 : f32
      %44 = vector.broadcast %cst_49 : f32 to vector<4x8x1xf32>
      %c0_50 = arith.constant 0 : index
      %c0_51 = arith.constant 0 : index
      %c0_52 = arith.constant 0 : index
      %45 = vector.load %arg9[%c0_50, %c0_51, %c0_52] : memref<4x8x1xf32, #tpu.memory_space<vmem>>, vector<4x8x1xf32>
      tpu.vector_store %arg9[%c0_50, %c0_51, %c0_52], %44 {strides = array<i32>} : memref<4x8x1xf32, #tpu.memory_space<vmem>>, vector<4x8x1xf32>,
      %cst_53 = arith.constant 0.000000e+00 : f32
      %46 = vector.broadcast %cst_53 : f32 to vector<4x8x8xf32>
      %c0_54 = arith.constant 0 : index
      %c0_55 = arith.constant 0 : index
      %c0_56 = arith.constant 0 : index
      %47 = vector.load %arg10[%c0_54, %c0_55, %c0_56] : memref<4x8x8xf32, #tpu.memory_space<vmem>>, vector<4x8x8xf32>
      tpu.vector_store %arg10[%c0_54, %c0_55, %c0_56], %46 {strides = array<i32>} : memref<4x8x8xf32, #tpu.memory_space<vmem>>, vector<4x8x8xf32>,
    } else {
    }
    %c0 = arith.constant 0 : index
    %c0_1 = arith.constant 0 : index
    %c0_2 = arith.constant 0 : index
    %c0_3 = arith.constant 0 : index
    %c0_4 = arith.constant 0 : index
    %3 = vector.load %arg4[%c0, %c0_1, %c0_2, %c0_3, %c0_4] : memref<8x1x1x4x8xf32, #tpu.memory_space<vmem>>, vector<8x1x1x4x8xf32>
    %4 = vector.shape_cast %3 : vector<8x1x1x4x8xf32> to vector<8x4x8xf32>
    %5 = tpu.transpose %4, [1, 0, 2] : vector<8x4x8xf32> -> vector<4x8x8xf32>
    %c0_5 = arith.constant 0 : index
    %c0_6 = arith.constant 0 : index
    %c0_7 = arith.constant 0 : index
    %c0_8 = arith.constant 0 : index
    %c0_9 = arith.constant 0 : index
    %6 = vector.load %arg5[%c0_5, %c0_6, %c0_7, %c0_8, %c0_9] : memref<8x1x1x4x8xf32, #tpu.memory_space<vmem>>, vector<8x1x1x4x8xf32>
    %7 = vector.shape_cast %6 : vector<8x1x1x4x8xf32> to vector<8x4x8xf32>
    %8 = tpu.transpose %7, [1, 0, 2] : vector<8x4x8xf32> -> vector<4x8x8xf32>
    %c0_10 = arith.constant 0 : index
    %c0_11 = arith.constant 0 : index
    %c0_12 = arith.constant 0 : index
    %9 = vector.load %arg7[%c0_10, %c0_11, %c0_12] : memref<4x8x8xf32, #tpu.memory_space<vmem>>, vector<4x8x8xf32>
    %cst = arith.constant dense<0.000000e+00> : vector<4x8x8xf32>
    %10 = tpu.matmul %9, %5, %cst {dimension_numbers = #tpu.dot_dimension_numbers<[2], [2], [1], [1], [0, 0, 0, 1, 1, 1], [0], [0]>} : vector<4x8x8xf32>, vector<4x8x8xf32>, vector<4x8x8xf32> -> vector<4x8x8xf32>
    %cst_13 = arith.constant 0.353553385 : f32
    %11 = vector.broadcast %cst_13 : f32 to vector<4x8x8xf32>
    %12 = arith.mulf %10, %11 : vector<4x8x8xf32>
    %c0_14 = arith.constant 0 : index
    %c0_15 = arith.constant 0 : index
    %c0_16 = arith.constant 0 : index
    %13 = vector.load %arg8[%c0_14, %c0_15, %c0_16] : memref<4x8x1xf32, #tpu.memory_space<vmem>>, vector<4x8x1xf32>
    %cst_17 = arith.constant dense<0xFF800000> : vector<4x8xf32>
    %14 = vector.multi_reduction <maximumf>, %12, %cst_17 [2] : vector<4x8x8xf32> to vector<4x8xf32>
    %15 = vector.shape_cast %14 : vector<4x8xf32> to vector<4x8x1xf32>
    %16 = arith.maximumf %13, %15 : vector<4x8x1xf32>
    %17 = arith.subf %13, %16 : vector<4x8x1xf32>
    %18 = math.exp %17 : vector<4x8x1xf32>
    %19 = vector.broadcast %16 : vector<4x8x1xf32> to vector<4x8x8xf32>
    %20 = arith.subf %12, %19 : vector<4x8x8xf32>
    %21 = math.exp %20 : vector<4x8x8xf32>
    %c0_18 = arith.constant 0 : index
    %c0_19 = arith.constant 0 : index
    %c0_20 = arith.constant 0 : index
    %22 = vector.load %arg9[%c0_18, %c0_19, %c0_20] : memref<4x8x1xf32, #tpu.memory_space<vmem>>, vector<4x8x1xf32>
    %23 = arith.mulf %18, %22 : vector<4x8x1xf32>
    %cst_21 = arith.constant dense<0.000000e+00> : vector<4x8xf32>
    %24 = vector.multi_reduction <add>, %21, %cst_21 [2] : vector<4x8x8xf32> to vector<4x8xf32>
    %25 = vector.shape_cast %24 : vector<4x8xf32> to vector<4x8x1xf32>
    %26 = arith.addf %23, %25 : vector<4x8x1xf32>
    %c0_22 = arith.constant 0 : index
    %c0_23 = arith.constant 0 : index
    %c0_24 = arith.constant 0 : index
    %27 = vector.load %arg9[%c0_22, %c0_23, %c0_24] : memref<4x8x1xf32, #tpu.memory_space<vmem>>, vector<4x8x1xf32>
    tpu.vector_store %arg9[%c0_22, %c0_23, %c0_24], %26 {strides = array<i32>} : memref<4x8x1xf32, #tpu.memory_space<vmem>>, vector<4x8x1xf32>,
    %c0_25 = arith.constant 0 : index
    %c0_26 = arith.constant 0 : index
    %c0_27 = arith.constant 0 : index
    %28 = vector.load %arg10[%c0_25, %c0_26, %c0_27] : memref<4x8x8xf32, #tpu.memory_space<vmem>>, vector<4x8x8xf32>
    %29 = vector.broadcast %18 : vector<4x8x1xf32> to vector<4x8x8xf32>
    %30 = arith.mulf %29, %28 : vector<4x8x8xf32>
    %cst_28 = arith.constant dense<0.000000e+00> : vector<4x8x8xf32>
    %31 = tpu.matmul %21, %8, %cst_28 {dimension_numbers = #tpu.dot_dimension_numbers<[2], [1], [1], [2], [0, 0, 0, 1, 1, 2], [0], [0]>} : vector<4x8x8xf32>, vector<4x8x8xf32>, vector<4x8x8xf32> -> vector<4x8x8xf32>
    %32 = arith.addf %30, %31 : vector<4x8x8xf32>
    %c0_29 = arith.constant 0 : index
    %c0_30 = arith.constant 0 : index
    %c0_31 = arith.constant 0 : index
    %33 = vector.load %arg10[%c0_29, %c0_30, %c0_31] : memref<4x8x8xf32, #tpu.memory_space<vmem>>, vector<4x8x8xf32>
    tpu.vector_store %arg10[%c0_29, %c0_30, %c0_31], %32 {strides = array<i32>} : memref<4x8x8xf32, #tpu.memory_space<vmem>>, vector<4x8x8xf32>,
    %c0_32 = arith.constant 0 : index
    %c0_33 = arith.constant 0 : index
    %c0_34 = arith.constant 0 : index
    %34 = vector.load %arg8[%c0_32, %c0_33, %c0_34] : memref<4x8x1xf32, #tpu.memory_space<vmem>>, vector<4x8x1xf32>
    tpu.vector_store %arg8[%c0_32, %c0_33, %c0_34], %16 {strides = array<i32>} : memref<4x8x1xf32, #tpu.memory_space<vmem>>, vector<4x8x1xf32>,
    %c0_i32_35 = arith.constant 0 : i32
    %35 = arith.cmpi eq, %arg2, %c0_i32_35 : i32
    %36 = arith.extui %35 : i1 to i32
    %c0_i32_36 = arith.constant 0 : i32
    %37 = arith.cmpi ne, %36, %c0_i32_36 : i32
    scf.if %37 {
      %c0_37 = arith.constant 0 : index
      %c0_38 = arith.constant 0 : index
      %c0_39 = arith.constant 0 : index
      %38 = vector.load %arg10[%c0_37, %c0_38, %c0_39] : memref<4x8x8xf32, #tpu.memory_space<vmem>>, vector<4x8x8xf32>
      %c0_40 = arith.constant 0 : index
      %c0_41 = arith.constant 0 : index
      %c0_42 = arith.constant 0 : index
      %39 = vector.load %arg9[%c0_40, %c0_41, %c0_42] : memref<4x8x1xf32, #tpu.memory_space<vmem>>, vector<4x8x1xf32>
      %40 = tpu.reciprocal %39 {approx = true} : vector<4x8x1xf32> -> vector<4x8x1xf32>
      %41 = vector.broadcast %40 : vector<4x8x1xf32> to vector<4x8x8xf32>
      %42 = arith.mulf %38, %41 : vector<4x8x8xf32>
      %43 = tpu.transpose %42, [1, 0, 2] : vector<4x8x8xf32> -> vector<8x4x8xf32>
      %c0_43 = arith.constant 0 : index
      %c0_44 = arith.constant 0 : index
      %c0_45 = arith.constant 0 : index
      %c0_46 = arith.constant 0 : index
      %44 = vector.load %arg6[%c0_43, %c0_44, %c0_45, %c0_46] : memref<8x1x4x8xf32, #tpu.memory_space<vmem>>, vector<8x1x4x8xf32>
      %45 = vector.shape_cast %44 : vector<8x1x4x8xf32> to vector<8x4x8xf32>
      %46 = vector.shape_cast %43 : vector<8x4x8xf32> to vector<8x1x4x8xf32>
      tpu.vector_store %arg6[%c0_43, %c0_44, %c0_45, %c0_46], %46 {strides = array<i32>} : memref<8x1x4x8xf32, #tpu.memory_space<vmem>>, vector<8x1x4x8xf32>,
    } else {
    }
    return
  }
  func.func @transform_0(%arg0: i32, %arg1: i32, %arg2: i32) -> (i32, i32, i32, i32, i32) {
    %c0_i32 = arith.constant 0 : i32
    %c0_i32_0 = arith.constant 0 : i32
    %c0_i32_1 = arith.constant 0 : i32
    %c0_i32_2 = arith.constant 0 : i32
    return %arg1, %arg0, %c0_i32, %c0_i32_0, %c0_i32_1 : i32, i32, i32, i32, i32
  }
  func.func @transform_1(%arg0: i32, %arg1: i32, %arg2: i32) -> (i32, i32, i32, i32, i32) {
    %c1_i32 = arith.constant 1 : i32
    %c0_i32 = arith.constant 0 : i32
    %c0_i32_0 = arith.constant 0 : i32
    %c0_i32_1 = arith.constant 0 : i32
    return %arg2, %arg0, %c1_i32, %c0_i32, %c0_i32_0 : i32, i32, i32, i32, i32
  }
  func.func @transform_2(%arg0: i32, %arg1: i32, %arg2: i32) -> (i32, i32, i32, i32, i32) {
    %c2_i32 = arith.constant 2 : i32
    %c0_i32 = arith.constant 0 : i32
    %c0_i32_0 = arith.constant 0 : i32
    %c0_i32_1 = arith.constant 0 : i32
    return %arg2, %arg0, %c2_i32, %c0_i32, %c0_i32_0 : i32, i32, i32, i32, i32
  }
  func.func @transform_3(%arg0: i32, %arg1: i32, %arg2: i32) -> (i32, i32, i32, i32) {
    %c0_i32 = arith.constant 0 : i32
    %c0_i32_0 = arith.constant 0 : i32
    %c0_i32_1 = arith.constant 0 : i32
    return %arg1, %arg0, %c0_i32, %c0_i32_0 : i32, i32, i32, i32
  }
}

module attributes {stable_mosaic.version = 11 : i64} {
  func.func @_fused_linear_kernel(%arg0: i32, %arg1: i32, %arg2: memref<16x32xf32, #tpu.memory_space<vmem>>, %arg3: memref<32x32xf32, #tpu.memory_space<vmem>>, %arg4: memref<1x32xf32, #tpu.memory_space<vmem>>, %arg5: memref<16x32xf32, #tpu.memory_space<vmem>>, %arg6: memref<16x32xf32, #tpu.memory_space<vmem>>) attributes {dimension_semantics = [#tpu.dimension_semantics<parallel>, #tpu.dimension_semantics<parallel>], iteration_bounds = array<i64: 1, 1>, scalar_prefetch = 0 : i64, scratch_operands = 0 : i64, tpu.core_type = #tpu.core_type<tc>, window_params = [{transform_indices = @transform_0, window_bounds = array<i64: 16, 32>}, {transform_indices = @transform_1, window_bounds = array<i64: 32, 32>}, {transform_indices = @transform_2, window_bounds = array<i64: 1, 32>}, {transform_indices = @transform_3, window_bounds = array<i64: 16, 32>}, {transform_indices = @transform_4, window_bounds = array<i64: 16, 32>}]} {
    %c0 = arith.constant 0 : index
    %c0_0 = arith.constant 0 : index
    %0 = vector.load %arg2[%c0, %c0_0] : memref<16x32xf32, #tpu.memory_space<vmem>>, vector<16x32xf32>
    %c0_1 = arith.constant 0 : index
    %c0_2 = arith.constant 0 : index
    %1 = vector.load %arg3[%c0_1, %c0_2] : memref<32x32xf32, #tpu.memory_space<vmem>>, vector<32x32xf32>
    %cst = arith.constant dense<0.000000e+00> : vector<16x32xf32>
    %2 = tpu.matmul %0, %1, %cst {dimension_numbers = #tpu.dot_dimension_numbers<[1], [0], [0], [1], [0, 0, 1, 1], [], []>} : vector<16x32xf32>, vector<32x32xf32>, vector<16x32xf32> -> vector<16x32xf32>
    %c0_3 = arith.constant 0 : index
    %c0_4 = arith.constant 0 : index
    %3 = vector.load %arg4[%c0_3, %c0_4] : memref<1x32xf32, #tpu.memory_space<vmem>>, vector<1x32xf32>
    %4 = vector.broadcast %3 : vector<1x32xf32> to vector<16x32xf32>
    %5 = arith.addf %2, %4 : vector<16x32xf32>
    %c0_5 = arith.constant 0 : index
    %c0_6 = arith.constant 0 : index
    %6 = vector.load %arg5[%c0_5, %c0_6] : memref<16x32xf32, #tpu.memory_space<vmem>>, vector<16x32xf32>
    %7 = arith.addf %5, %6 : vector<16x32xf32>
    %c0_7 = arith.constant 0 : index
    %c0_8 = arith.constant 0 : index
    %8 = vector.load %arg6[%c0_7, %c0_8] : memref<16x32xf32, #tpu.memory_space<vmem>>, vector<16x32xf32>
    tpu.vector_store %arg6[%c0_7, %c0_8], %7 {strides = array<i32>} : memref<16x32xf32, #tpu.memory_space<vmem>>, vector<16x32xf32>,
    return
  }
  func.func @transform_0(%arg0: i32, %arg1: i32) -> (i32, i32) {
    %c0_i32 = arith.constant 0 : i32
    %c0_i32_0 = arith.constant 0 : i32
    return %arg1, %c0_i32 : i32, i32
  }
  func.func @transform_1(%arg0: i32, %arg1: i32) -> (i32, i32) {
    %c0_i32 = arith.constant 0 : i32
    %c0_i32_0 = arith.constant 0 : i32
    return %c0_i32, %arg0 : i32, i32
  }
  func.func @transform_2(%arg0: i32, %arg1: i32) -> (i32, i32) {
    %c0_i32 = arith.constant 0 : i32
    %c0_i32_0 = arith.constant 0 : i32
    return %c0_i32, %arg0 : i32, i32
  }
  func.func @transform_3(%arg0: i32, %arg1: i32) -> (i32, i32) {
    %c0_i32 = arith.constant 0 : i32
    return %arg1, %arg0 : i32, i32
  }
  func.func @transform_4(%arg0: i32, %arg1: i32) -> (i32, i32) {
    %c0_i32 = arith.constant 0 : i32
    return %arg1, %arg0 : i32, i32
  }
}

module attributes {stable_mosaic.version = 11 : i64} {
  func.func @_fused_linear_kernel(%arg0: i32, %arg1: i32, %arg2: memref<16x32xf32, #tpu.memory_space<vmem>>, %arg3: memref<1x32xf32, #tpu.memory_space<vmem>>, %arg4: memref<1x32xf32, #tpu.memory_space<vmem>>, %arg5: memref<32x128xf32, #tpu.memory_space<vmem>>, %arg6: memref<1x128xf32, #tpu.memory_space<vmem>>, %arg7: memref<16x128xf32, #tpu.memory_space<vmem>>) attributes {dimension_semantics = [#tpu.dimension_semantics<parallel>, #tpu.dimension_semantics<parallel>], iteration_bounds = array<i64: 1, 1>, scalar_prefetch = 0 : i64, scratch_operands = 0 : i64, tpu.core_type = #tpu.core_type<tc>, window_params = [{transform_indices = @transform_0, window_bounds = array<i64: 16, 32>}, {pipeline_mode = #tpu.pipeline_mode<synchronous>, transform_indices = @transform_1, window_bounds = array<i64: 1, 32>}, {pipeline_mode = #tpu.pipeline_mode<synchronous>, transform_indices = @transform_2, window_bounds = array<i64: 1, 32>}, {transform_indices = @transform_3, window_bounds = array<i64: 32, 128>}, {transform_indices = @transform_4, window_bounds = array<i64: 1, 128>}, {transform_indices = @transform_5, window_bounds = array<i64: 16, 128>}]} {
    %c0 = arith.constant 0 : index
    %c0_0 = arith.constant 0 : index
    %0 = vector.load %arg2[%c0, %c0_0] : memref<16x32xf32, #tpu.memory_space<vmem>>, vector<16x32xf32>
    %cst = arith.constant dense<0.000000e+00> : vector<16xf32>
    %1 = vector.multi_reduction <add>, %0, %cst [1] : vector<16x32xf32> to vector<16xf32>
    %2 = vector.shape_cast %1 : vector<16xf32> to vector<16x1xf32>
    %cst_1 = arith.constant 3.200000e+01 : f32
    %3 = vector.broadcast %cst_1 : f32 to vector<16x1xf32>
    %4 = arith.divf %2, %3 : vector<16x1xf32>
    %5 = vector.broadcast %4 : vector<16x1xf32> to vector<16x32xf32>
    %6 = arith.subf %0, %5 : vector<16x32xf32>
    %7 = arith.mulf %6, %6 : vector<16x32xf32>
    %cst_2 = arith.constant dense<0.000000e+00> : vector<16xf32>
    %8 = vector.multi_reduction <add>, %7, %cst_2 [1] : vector<16x32xf32> to vector<16xf32>
    %9 = vector.shape_cast %8 : vector<16xf32> to vector<16x1xf32>
    %cst_3 = arith.constant 3.200000e+01 : f32
    %10 = vector.broadcast %cst_3 : f32 to vector<16x1xf32>
    %11 = arith.divf %9, %10 : vector<16x1xf32>
    %12 = vector.broadcast %4 : vector<16x1xf32> to vector<16x32xf32>
    %13 = arith.subf %0, %12 : vector<16x32xf32>
    %cst_4 = arith.constant 9.99999974E-6 : f32
    %14 = vector.broadcast %cst_4 : f32 to vector<16x1xf32>
    %15 = arith.addf %11, %14 : vector<16x1xf32>
    %16 = math.rsqrt %15 : vector<16x1xf32>
    %17 = vector.broadcast %16 : vector<16x1xf32> to vector<16x32xf32>
    %18 = arith.mulf %13, %17 : vector<16x32xf32>
    %c0_5 = arith.constant 0 : index
    %c0_6 = arith.constant 0 : index
    %19 = vector.load %arg3[%c0_5, %c0_6] : memref<1x32xf32, #tpu.memory_space<vmem>>, vector<1x32xf32>
    %20 = vector.broadcast %19 : vector<1x32xf32> to vector<16x32xf32>
    %21 = arith.mulf %18, %20 : vector<16x32xf32>
    %c0_7 = arith.constant 0 : index
    %c0_8 = arith.constant 0 : index
    %22 = vector.load %arg4[%c0_7, %c0_8] : memref<1x32xf32, #tpu.memory_space<vmem>>, vector<1x32xf32>
    %23 = vector.broadcast %22 : vector<1x32xf32> to vector<16x32xf32>
    %24 = arith.addf %21, %23 : vector<16x32xf32>
    %c0_9 = arith.constant 0 : index
    %c0_10 = arith.constant 0 : index
    %25 = vector.load %arg5[%c0_9, %c0_10] : memref<32x128xf32, #tpu.memory_space<vmem>>, vector<32x128xf32>
    %cst_11 = arith.constant dense<0.000000e+00> : vector<16x128xf32>
    %26 = tpu.matmul %24, %25, %cst_11 {dimension_numbers = #tpu.dot_dimension_numbers<[1], [0], [0], [1], [0, 0, 1, 1], [], []>} : vector<16x32xf32>, vector<32x128xf32>, vector<16x128xf32> -> vector<16x128xf32>
    %c0_12 = arith.constant 0 : index
    %c0_13 = arith.constant 0 : index
    %27 = vector.load %arg6[%c0_12, %c0_13] : memref<1x128xf32, #tpu.memory_space<vmem>>, vector<1x128xf32>
    %28 = vector.broadcast %27 : vector<1x128xf32> to vector<16x128xf32>
    %29 = arith.addf %26, %28 : vector<16x128xf32>
    %cst_14 = arith.constant 5.000000e-01 : f32
    %30 = vector.broadcast %cst_14 : f32 to vector<16x128xf32>
    %31 = arith.mulf %30, %29 : vector<16x128xf32>
    %cst_15 = arith.constant 0.707106769 : f32
    %32 = vector.broadcast %cst_15 : f32 to vector<16x128xf32>
    %33 = arith.mulf %29, %32 : vector<16x128xf32>
    %34 = math.erf %33 : vector<16x128xf32>
    %cst_16 = arith.constant 1.000000e+00 : f32
    %35 = vector.broadcast %cst_16 : f32 to vector<16x128xf32>
    %36 = arith.addf %35, %34 : vector<16x128xf32>
    %37 = arith.mulf %31, %36 : vector<16x128xf32>
    %c0_17 = arith.constant 0 : index
    %c0_18 = arith.constant 0 : index
    %38 = vector.load %arg7[%c0_17, %c0_18] : memref<16x128xf32, #tpu.memory_space<vmem>>, vector<16x128xf32>
    tpu.vector_store %arg7[%c0_17, %c0_18], %37 {strides = array<i32>} : memref<16x128xf32, #tpu.memory_space<vmem>>, vector<16x128xf32>,
    return
  }
  func.func @transform_0(%arg0: i32, %arg1: i32) -> (i32, i32) {
    %c0_i32 = arith.constant 0 : i32
    %c0_i32_0 = arith.constant 0 : i32
    return %arg1, %c0_i32 : i32, i32
  }
  func.func @transform_1(%arg0: i32, %arg1: i32) -> (i32, i32) {
    %c0_i32 = arith.constant 0 : i32
    %c0_i32_0 = arith.constant 0 : i32
    %c0_i32_1 = arith.constant 0 : i32
    return %c0_i32, %c0_i32_0 : i32, i32
  }
  func.func @transform_2(%arg0: i32, %arg1: i32) -> (i32, i32) {
    %c0_i32 = arith.constant 0 : i32
    %c0_i32_0 = arith.constant 0 : i32
    %c0_i32_1 = arith.constant 0 : i32
    return %c0_i32, %c0_i32_0 : i32, i32
  }
  func.func @transform_3(%arg0: i32, %arg1: i32) -> (i32, i32) {
    %c0_i32 = arith.constant 0 : i32
    %c0_i32_0 = arith.constant 0 : i32
    return %c0_i32, %arg0 : i32, i32
  }
  func.func @transform_4(%arg0: i32, %arg1: i32) -> (i32, i32) {
    %c0_i32 = arith.constant 0 : i32
    %c0_i32_0 = arith.constant 0 : i32
    return %c0_i32, %arg0 : i32, i32
  }
  func.func @transform_5(%arg0: i32, %arg1: i32) -> (i32, i32) {
    %c0_i32 = arith.constant 0 : i32
    return %arg1, %arg0 : i32, i32
  }
}

module attributes {stable_mosaic.version = 11 : i64} {
  func.func @_fused_linear_kernel(%arg0: i32, %arg1: i32, %arg2: memref<16x128xf32, #tpu.memory_space<vmem>>, %arg3: memref<128x32xf32, #tpu.memory_space<vmem>>, %arg4: memref<1x32xf32, #tpu.memory_space<vmem>>, %arg5: memref<16x32xf32, #tpu.memory_space<vmem>>, %arg6: memref<16x32xf32, #tpu.memory_space<vmem>>) attributes {dimension_semantics = [#tpu.dimension_semantics<parallel>, #tpu.dimension_semantics<parallel>], iteration_bounds = array<i64: 1, 1>, scalar_prefetch = 0 : i64, scratch_operands = 0 : i64, tpu.core_type = #tpu.core_type<tc>, window_params = [{transform_indices = @transform_0, window_bounds = array<i64: 16, 128>}, {transform_indices = @transform_1, window_bounds = array<i64: 128, 32>}, {transform_indices = @transform_2, window_bounds = array<i64: 1, 32>}, {transform_indices = @transform_3, window_bounds = array<i64: 16, 32>}, {transform_indices = @transform_4, window_bounds = array<i64: 16, 32>}]} {
    %c0 = arith.constant 0 : index
    %c0_0 = arith.constant 0 : index
    %0 = vector.load %arg2[%c0, %c0_0] : memref<16x128xf32, #tpu.memory_space<vmem>>, vector<16x128xf32>
    %c0_1 = arith.constant 0 : index
    %c0_2 = arith.constant 0 : index
    %1 = vector.load %arg3[%c0_1, %c0_2] : memref<128x32xf32, #tpu.memory_space<vmem>>, vector<128x32xf32>
    %cst = arith.constant dense<0.000000e+00> : vector<16x32xf32>
    %2 = tpu.matmul %0, %1, %cst {dimension_numbers = #tpu.dot_dimension_numbers<[1], [0], [0], [1], [0, 0, 1, 1], [], []>} : vector<16x128xf32>, vector<128x32xf32>, vector<16x32xf32> -> vector<16x32xf32>
    %c0_3 = arith.constant 0 : index
    %c0_4 = arith.constant 0 : index
    %3 = vector.load %arg4[%c0_3, %c0_4] : memref<1x32xf32, #tpu.memory_space<vmem>>, vector<1x32xf32>
    %4 = vector.broadcast %3 : vector<1x32xf32> to vector<16x32xf32>
    %5 = arith.addf %2, %4 : vector<16x32xf32>
    %c0_5 = arith.constant 0 : index
    %c0_6 = arith.constant 0 : index
    %6 = vector.load %arg5[%c0_5, %c0_6] : memref<16x32xf32, #tpu.memory_space<vmem>>, vector<16x32xf32>
    %7 = arith.addf %5, %6 : vector<16x32xf32>
    %c0_7 = arith.constant 0 : index
    %c0_8 = arith.constant 0 : index
    %8 = vector.load %arg6[%c0_7, %c0_8] : memref<16x32xf32, #tpu.memory_space<vmem>>, vector<16x32xf32>
    tpu.vector_store %arg6[%c0_7, %c0_8], %7 {strides = array<i32>} : memref<16x32xf32, #tpu.memory_space<vmem>>, vector<16x32xf32>,
    return
  }
  func.func @transform_0(%arg0: i32, %arg1: i32) -> (i32, i32) {
    %c0_i32 = arith.constant 0 : i32
    %c0_i32_0 = arith.constant 0 : i32
    return %arg1, %c0_i32 : i32, i32
  }
  func.func @transform_1(%arg0: i32, %arg1: i32) -> (i32, i32) {
    %c0_i32 = arith.constant 0 : i32
    %c0_i32_0 = arith.constant 0 : i32
    return %c0_i32, %arg0 : i32, i32
  }
  func.func @transform_2(%arg0: i32, %arg1: i32) -> (i32, i32) {
    %c0_i32 = arith.constant 0 : i32
    %c0_i32_0 = arith.constant 0 : i32
    return %c0_i32, %arg0 : i32, i32
  }
  func.func @transform_3(%arg0: i32, %arg1: i32) -> (i32, i32) {
    %c0_i32 = arith.constant 0 : i32
    return %arg1, %arg0 : i32, i32
  }
  func.func @transform_4(%arg0: i32, %arg1: i32) -> (i32, i32) {
    %c0_i32 = arith.constant 0 : i32
    return %arg1, %arg0 : i32, i32
  }
}

</mosaic_0001>

<bundles_post_ra>
// kernel: transformer_encoder_layer_qkv.5
= control target key start
LH: loop header
LB: loop body
LE: loop exit
PB: predicated region body
PF: predicated region fallthrough
CT: control target
= control target key end

     0   :  { %10 = vsyncpa [#allocation3], 0  ;;  %s243_s18 = smov [#allocation2]   ;;  %s315_s0 = inlined_call_operand.vmem [shape: f32[16,32], index: 0, kind: input, shape index: {}]   ;;  %s316_s1 = inlined_call_operand.vmem [shape: f32[1,32], index: 1, kind: input, shape index: {}]   ;;  %s317_s2 = inlined_call_operand.vmem [shape: f32[1,32], index: 2, kind: input, shape index: {}]   ;;  %s318_s3 = inlined_call_operand.hbm [shape: f32[32,96], index: 3, kind: input, shape index: {}]   ;;  %s319_s4 = inlined_call_operand.vmem [shape: f32[1,96], index: 4, kind: input, shape index: {}]   ;;  %s320_s5 = inlined_call_operand.vmem [shape: f32[16,96], index: 5, kind: output, shape index: {}]  }
   0x1   :  { %s22_s19 = sshll.u32 %s243_s18, 4  ;;  %s219_s22 = scalar_lea.hbm %s318_s3, 512  ;;  %s23_s19 = int_to_ptr.vmem [resolvable:$true] %s22_s19 }
   0x2   :  { %p220_p0 = scmp.ne.s32.totalorder %s318_s3, %s219_s22  ;;  %p223_p1 = scmp.lt.u32.totalorder %s219_s22, %s318_s3 }
   0x4   :  { %p225_p2 = pnand %p223_p1, %p220_p0 }
   0x6   :  { %228 = shalt.err (!%p225_p2)
}
   0x7   :  { %s229_s27 = scalar_lea.vmem %s23_s19, 512  ;;  %p234_p4 = scmp.lt.s32.totalorder %s23_s19, %s23_s19 }
   0x8   :  { %p230_p3 = scmp.ne.s32.totalorder %s23_s19, %s229_s27  ;;  %p235_p5 = scmp.lt.s32.totalorder %s229_s27, %s229_s27 }
   0xa   :  { %p236_p6 = por %p235_p5, %p234_p4 }
   0xc   :  { %p237_p7 = pnand %p236_p6, %p230_p3 }
   0xe   :  { %240 = shalt.err (!%p237_p7)
}
   0xf   :  { %s244_s28 = smov 128   ;;  %s245_s29 = smov 8  }
  0x10   :  { %28 = dma.hbm_to_vmem [thread:$0]  %s318_s3, 512, %s23_s19, [#allocation3], %s244_s28, %s244_s28, %s245_s29  }
  0x11   :  { %241 = dma.done.wait [#allocation3], 512  }
  0x12   :  { %242 = vsyncadd [#allocation3], 4294966784  ;;  %vm36_vm0 = vcmask 261120   ;;  %v34_v0 = vld [vmem:[%s315_s0] sm:$0xff]  ;;  %v35_v1 = vld [vmem:[%s315_s0 + $0x8] sm:$0xff]  ;;  %vm174_vm1 = vcmask 785408  }
  0x13   :  { %v37_v2 = vsel %vm36_vm0, %v34_v0, 0.0  ;;  %v40_v3 = vsel %vm36_vm0, %v35_v1, 0.0  ;;  %v82_v14 = vld [vmem:[#allocation2] sm:$0xff]  ;;  %v83_v15 = vld [vmem:[#allocation2 + $0x8] sm:$0xff]  ;;  %v84_v16 = vld [vmem:[#allocation2 + $0x10] sm:$0xff] }
  0x14   :  { %38 = vadd.xlane.f32.xlu0 %v37_v2  ;;  %v204_v17 = vpack.c.bf16 %v83_v15, %v82_v14  ;;  %v85_v18 = vld [vmem:[#allocation2 + $0x18] sm:$0xff]  ;;  %v182_v27 = vld [vmem:[%s316_s1] ss:$0 sm:$0xff] }
  0x15   :  { %v208_v19 = vpack.c.bf16 %v85_v18, %v84_v16  ;;  %v183_v29 = vld [vmem:[%s317_s2] ss:$0 sm:$0xff] }
  0x16   :  { %205 = vmatprep.subr.bf16.mxu0 %v204_v17  ;;  %v184_v36 = vld [vmem:[%s319_s4] ss:$0 sm:$0xff] }
  0x17   :  { %207 = vmatpush3.bf16.msra.mxu0 %v204_v17 }
  0x18   :  { %41 = vadd.xlane.f32.xlu0 %v40_v3  ;;  %209 = vmatprep.subr.bf16.mxu0 %v208_v19 }
  0x1b   :  { %211 = vmatpush3.bf16.msra.mxu0 %v208_v19 }
  0xa1   :  { %v39_v4 = vpop.xlane.xlu0 %38 }
  0xa2   :  { %v44_v5 = vmul.f32 0.03125, %v39_v4 }
  0xa4   :  { %v46_v6 = vsub.f32 %v34_v0, %v44_v5 }
  0xa5   :  { %v42_v7 = vpop.xlane.xlu0 %41 }
  0xa6   :  { %v45_v8 = vmul.f32 0.03125, %v42_v7  ;;  %v48_v9 = vmul.f32 %v46_v6, %v46_v6 }
  0xa8   :  { %v47_v10 = vsub.f32 %v35_v1, %v45_v8  ;;  %v50_v11 = vsel %vm36_vm0, %v48_v9, 0.0 }
  0xa9   :  { %51 = vadd.xlane.f32.xlu1 %v50_v11 }
  0xaa   :  { %v49_v12 = vmul.f32 %v47_v10, %v47_v10 }
  0xac   :  { %v53_v13 = vsel %vm36_vm0, %v49_v12, 0.0 }
  0xad   :  { %54 = vadd.xlane.f32.xlu1 %v53_v13 }
 0x136   :  { %v52_v20 = vpop.xlane.xlu1 %51 }
 0x137   :  { %v56_v21 = vmul.f32 0.03125, %v52_v20 }
 0x139   :  { %v58_v22 = vadd.f32 1e-05, %v56_v21 }
 0x13a   :  { %v55_v23 = vpop.xlane.xlu1 %54 }
 0x13b   :  { %215 = vrsqrt.f32 %v58_v22  ;;  %v57_v24 = vmul.f32 0.03125, %v55_v23 }
 0x13d   :  { %v59_v25 = vadd.f32 1e-05, %v57_v24 }
 0x13f   :  { %217 = vrsqrt.f32 %v59_v25 }
 0x145   :  { %v216_v26 = vpop.eup %215 }
 0x146   :  { %v62_v28 = vmul.f32 %v216_v26, %v46_v6 }
 0x148   :  { %v71_v30 = vmul.f32 %v182_v27, %v62_v28 }
 0x149   :  { %v218_v31 = vpop.eup %217 }
 0x14a   :  { %v63_v32 = vmul.f32 %v218_v31, %v47_v10  ;;  %v80_v33 = vadd.f32 %v183_v29, %v71_v30 }
 0x14c   :  { %v72_v34 = vmul.f32 %v182_v27, %v63_v32  ;;  %201 = vmatprep.mubr.msk.f32.mxu0 %vm36_vm0, %v80_v33 }
 0x14e   :  { %v81_v35 = vadd.f32 %v183_v29, %v72_v34 }
 0x150   :  { %202 = vmatmul.mubr.msk.f32.vlgmr.msra.gmra.mrb[0].mxu0 %vm36_vm0, %v81_v35 }
 0x223   :  { %v203_v37 = vpop.f32.mrb[0].mxu0 }
 0x224   :  { %v171_v38 = vadd.f32 %v203_v37, %v184_v36  ;;  %v165_v39 = vpop.f32.mrb[1].mxu0 }
 0x225   :  { %v166_v40 = vadd.f32 %v184_v36, %v165_v39 }
 0x226   :  { %176 = vst.msk [vmem:[%s320_s5 + $0x8] sm:$0xff] %vm174_vm1, %v171_v38 }
 0x227   :  { %175 = vst.msk [vmem:[%s320_s5] sm:$0xff] %vm174_vm1, %v166_v40 }
 0x228   :  { %181 = vsyncpa [#allocation3], 1 }

// kernel: transformer_encoder_layer_qkv.7
= control target key start
LH: loop header
LB: loop body
LE: loop exit
PB: predicated region body
PF: predicated region fallthrough
CT: control target
= control target key end

     0   :  { %vm30_vm0 = vcmask 261120   ;;  %s212_s1 = inlined_call_operand.vmem [shape: f32[32,32], index: 1, kind: input, shape index: {}]   ;;  %s213_s0 = inlined_call_operand.vmem [shape: f32[16,32], index: 0, kind: input, shape index: {}]   ;;  %s214_s2 = inlined_call_operand.vmem [shape: f32[1,32], index: 2, kind: input, shape index: {}]   ;;  %s215_s3 = inlined_call_operand.vmem [shape: f32[16,32], index: 3, kind: input, shape index: {}]   ;;  %s216_s4 = inlined_call_operand.vmem [shape: f32[16,32], index: 4, kind: output, shape index: {}]  }
   0x1   :  { %v19_v0 = vld [vmem:[%s212_s1] sm:$0xff]  ;;  %v20_v1 = vld [vmem:[%s212_s1 + $0x8] sm:$0xff]  ;;  %v21_v2 = vld [vmem:[%s212_s1 + $0x10] sm:$0xff] }
   0x2   :  { %v142_v3 = vpack.c.bf16 %v20_v1, %v19_v0  ;;  %v22_v4 = vld [vmem:[%s212_s1 + $0x18] sm:$0xff]  ;;  %v17_v5 = vld [vmem:[%s213_s0] sm:$0xff]  ;;  %v18_v7 = vld [vmem:[%s213_s0 + $0x8] sm:$0xff] }
   0x3   :  { %v146_v6 = vpack.c.bf16 %v22_v4, %v21_v2  ;;  %139 = vmatprep.mubr.msk.f32.mxu0 %vm30_vm0, %v17_v5  ;;  %v122_v8 = vld [vmem:[%s214_s2] ss:$0 sm:$0xff]  ;;  %v113_v10 = vld [vmem:[%s215_s3 + $0x8] sm:$0xff] }
   0x4   :  { %143 = vmatprep.subr.bf16.mxu0 %v142_v3  ;;  %v112_v13 = vld [vmem:[%s215_s3] sm:$0xff] }
   0x5   :  { %145 = vmatpush3.bf16.msra.mxu0 %v142_v3 }
   0x6   :  { %147 = vmatprep.subr.bf16.mxu0 %v146_v6 }
   0x9   :  { %149 = vmatpush3.bf16.msra.mxu0 %v146_v6 }
   0xc   :  { %140 = vmatmul.mubr.msk.f32.vlgmr.msra.gmra.mrb[0].mxu0 %vm30_vm0, %v18_v7 }
  0xdf   :  { %v141_v9 = vpop.f32.mrb[0].mxu0 }
  0xe0   :  { %v109_v11 = vadd.f32 %v141_v9, %v122_v8  ;;  %v103_v12 = vpop.f32.mrb[1].mxu0 }
  0xe1   :  { %v104_v14 = vadd.f32 %v122_v8, %v103_v12 }
  0xe2   :  { %v115_v15 = vadd.f32 %v113_v10, %v109_v11 }
  0xe3   :  { %v114_v16 = vadd.f32 %v112_v13, %v104_v14 }
  0xe4   :  { %117 = vst.msk [vmem:[%s216_s4 + $0x8] sm:$0xff] %vm30_vm0, %v115_v15 }
  0xe5   :  { %116 = vst.msk [vmem:[%s216_s4] sm:$0xff] %vm30_vm0, %v114_v16 }

// kernel: transformer_encoder_layer_qkv.8
= control target key start
LH: loop header
LB: loop body
LE: loop exit
PB: predicated region body
PF: predicated region fallthrough
CT: control target
= control target key end

     0   :  { %vm22_vm0 = vcmask 261120   ;;  %s283_s0 = inlined_call_operand.vmem [shape: f32[16,32], index: 0, kind: input, shape index: {}]   ;;  %s284_s3 = inlined_call_operand.vmem [shape: f32[32,128], index: 3, kind: input, shape index: {}]   ;;  %s285_s1 = inlined_call_operand.vmem [shape: f32[1,32], index: 1, kind: input, shape index: {}]   ;;  %s286_s2 = inlined_call_operand.vmem [shape: f32[1,32], index: 2, kind: input, shape index: {}]   ;;  %s287_s4 = inlined_call_operand.vmem [shape: f32[1,128], index: 4, kind: input, shape index: {}]   ;;  %s288_s5 = inlined_call_operand.vmem [shape: f32[16,128], index: 5, kind: output, shape index: {}]  }
   0x1   :  { %v20_v0 = vld [vmem:[%s283_s0] sm:$0xff]  ;;  %v21_v1 = vld [vmem:[%s283_s0 + $0x8] sm:$0xff]  ;;  %v70_v16 = vld [vmem:[%s284_s3 + $0x10] sm:$0xff] }
   0x2   :  { %v23_v2 = vsel %vm22_vm0, %v20_v0, 0.0  ;;  %v26_v3 = vsel %vm22_vm0, %v21_v1, 0.0  ;;  %v68_v14 = vld [vmem:[%s284_s3] sm:$0xff]  ;;  %v69_v15 = vld [vmem:[%s284_s3 + $0x8] sm:$0xff]  ;;  %v71_v18 = vld [vmem:[%s284_s3 + $0x18] sm:$0xff] }
   0x3   :  { %24 = vadd.xlane.f32.xlu0 %v23_v2  ;;  %v198_v17 = vpack.c.bf16 %v69_v15, %v68_v14  ;;  %v202_v19 = vpack.c.bf16 %v71_v18, %v70_v16  ;;  %v176_v27 = vld [vmem:[%s285_s1] ss:$0 sm:$0xff] }
   0x4   :  { %v177_v29 = vld [vmem:[%s286_s2] ss:$0 sm:$0xff] }
   0x5   :  { %199 = vmatprep.subr.bf16.mxu0 %v198_v17  ;;  %v178_v36 = vld [vmem:[%s287_s4] ss:$0 sm:$0xff] }
   0x6   :  { %201 = vmatpush3.bf16.msra.mxu0 %v198_v17 }
   0x7   :  { %27 = vadd.xlane.f32.xlu0 %v26_v3  ;;  %203 = vmatprep.subr.bf16.mxu0 %v202_v19 }
   0xa   :  { %205 = vmatpush3.bf16.msra.mxu0 %v202_v19 }
  0x90   :  { %v25_v4 = vpop.xlane.xlu0 %24 }
  0x91   :  { %v30_v5 = vmul.f32 0.03125, %v25_v4 }
  0x93   :  { %v32_v6 = vsub.f32 %v20_v0, %v30_v5 }
  0x94   :  { %v28_v7 = vpop.xlane.xlu0 %27 }
  0x95   :  { %v31_v8 = vmul.f32 0.03125, %v28_v7  ;;  %v34_v9 = vmul.f32 %v32_v6, %v32_v6 }
  0x97   :  { %v33_v10 = vsub.f32 %v21_v1, %v31_v8  ;;  %v36_v11 = vsel %vm22_vm0, %v34_v9, 0.0 }
  0x98   :  { %37 = vadd.xlane.f32.xlu1 %v36_v11 }
  0x99   :  { %v35_v12 = vmul.f32 %v33_v10, %v33_v10 }
  0x9b   :  { %v39_v13 = vsel %vm22_vm0, %v35_v12, 0.0 }
  0x9c   :  { %40 = vadd.xlane.f32.xlu1 %v39_v13 }
 0x125   :  { %v38_v20 = vpop.xlane.xlu1 %37 }
 0x126   :  { %v42_v21 = vmul.f32 0.03125, %v38_v20 }
 0x128   :  { %v44_v22 = vadd.f32 1e-05, %v42_v21 }
 0x129   :  { %v41_v23 = vpop.xlane.xlu1 %40 }
 0x12a   :  { %206 = vrsqrt.f32 %v44_v22  ;;  %v43_v24 = vmul.f32 0.03125, %v41_v23 }
 0x12c   :  { %v45_v25 = vadd.f32 1e-05, %v43_v24 }
 0x12e   :  { %208 = vrsqrt.f32 %v45_v25 }
 0x134   :  { %v207_v26 = vpop.eup %206 }
 0x135   :  { %v48_v28 = vmul.f32 %v207_v26, %v32_v6 }
 0x137   :  { %v57_v30 = vmul.f32 %v176_v27, %v48_v28 }
 0x138   :  { %v209_v31 = vpop.eup %208 }
 0x139   :  { %v49_v32 = vmul.f32 %v209_v31, %v33_v10  ;;  %v66_v33 = vadd.f32 %v177_v29, %v57_v30 }
 0x13b   :  { %v58_v34 = vmul.f32 %v176_v27, %v49_v32  ;;  %195 = vmatprep.mubr.msk.f32.mxu0 %vm22_vm0, %v66_v33 }
 0x13d   :  { %v67_v35 = vadd.f32 %v177_v29, %v58_v34 }
 0x13f   :  { %196 = vmatmul.mubr.msk.f32.vlgmr.msra.gmra.mrb[0].mxu0 %vm22_vm0, %v67_v35 }
 0x212   :  { %v197_v37 = vpop.f32.mrb[0].mxu0 }
 0x213   :  { %v157_v38 = vadd.f32 %v197_v37, %v178_v36  ;;  %v151_v39 = vpop.f32.mrb[1].mxu0 }
 0x214   :  { %v152_v40 = vadd.f32 %v178_v36, %v151_v39 }
 0x215   :  { %v163_v41 = vmul.f32 0.70710677, %v157_v38  ;;  %v161_v45 = vmul.f32 0.5, %v157_v38 }
 0x216   :  { %v162_v42 = vmul.f32 0.70710677, %v152_v40  ;;  %v160_v47 = vmul.f32 0.5, %v152_v40 }
 0x217   :  { %210 = verf.f32 %v163_v41 }
 0x218   :  { %212 = verf.f32 %v162_v42 }
 0x221   :  { %v211_v43 = vpop.eup %210 }
 0x222   :  { %v213_v44 = vpop.eup %212  ;;  %v167_v46 = vadd.f32 1.0, %v211_v43 }
 0x223   :  { %v166_v48 = vadd.f32 1.0, %v213_v44 }
 0x224   :  { %v169_v49 = vmul.f32 %v167_v46, %v161_v45 }
 0x225   :  { %v168_v50 = vmul.f32 %v166_v48, %v160_v47 }
 0x226   :  { %171 = vst [vmem:[%s288_s5 + $0x8] sm:$0xff] %v169_v49 }
 0x227   :  { %170 = vst [vmem:[%s288_s5] sm:$0xff] %v168_v50 }

// kernel: transformer_encoder_layer_qkv.6
= control target key start
LH: loop header
LB: loop body
LE: loop exit
PB: predicated region body
PF: predicated region fallthrough
CT: control target
= control target key end

     0   :  { %s2011_s12 = smov 0   ;;  %s2013_s13 = smov 0   ;;  %s2301_s0 = inlined_call_operand.vmem [shape: f32[8,2,3,4,8], index: 0, kind: input, shape index: {}, may-alias: {0,1,2}]   ;;  %s2302_s1 = inlined_call_operand.vmem [shape: f32[8,2,3,4,8], index: 1, kind: input, shape index: {}, may-alias: {0,1,2}]   ;;  %s2303_s2 = inlined_call_operand.vmem [shape: f32[8,2,3,4,8], index: 2, kind: input, shape index: {}, may-alias: {0,1,2}]   ;;  %s2304_s3 = inlined_call_operand.vmem [shape: f32[8,2,4,8], index: 3, kind: output, shape index: {}]  }
   0x1   :  { %s2015_s14 = smov 0   ;;  %s2017_s15 = smov 0  }
   0x2   :  { %s2019_s16 = smov 0  }
   0x3 LB: > { %s32_s17 = sadd.s32 1, %s1979_s15  ;;  %s1757_s18 = sadd.s32 4294967295, %s1983_s16   ;;  %s1983_s16 = sphi %s2019_s16, %s13_s16   ;;  %s1979_s15 = sphi %s2017_s15, %s2310_s15   ;;  %s1975_s14 = sphi %s2015_s14, %s2309_s14   ;;  %s1971_s13 = sphi %s2013_s13, %s2308_s13   ;;  %s1967_s12 = sphi %s2011_s12, %s2307_s12  }
   0x4   : > { %p34_p0 = scmp.ge.s32.totalorder %s32_s17, 2  ;;  %p48_p1 = scmp.ne.s32.totalorder %s1971_s13, %s1967_s12 }
   0x5   : > { %p49_p2 = scmp.eq.s32.totalorder %s1983_s16, 0  ;;  %p136_p4 = scmp.eq.s32.totalorder %s1757_s18, 1 }
   0x6   : > { %s2312_s17 = smov (%p34_p0, %s32_s17), 0  ;;  %s41_s21 = sadd.s32 1, %s1971_s13 }
   0x7   : > { %p2043_p3 = por %p49_p2, %p48_p1  ;;  %s37_s20 = ssub.s32 %s1979_s15, %s2312_s17 }
   0x8   : > { %p39_p5 = scmp.eq.s32.totalorder %s37_s20, 0  ;;  %p2050_p6 = por %p136_p4, %p48_p1 }
   0x9   : > { %p1760_p7 = scmp.ge.s32.totalorder %s1983_s16, 2 }
   0xa   : > { %s2055_s23 = scalar_select %p39_p5, %s1971_s13, %s41_s21  }
   0xb   : > { %158 = sbr.rel (%p1760_p7) target bundleno = 48 (0x30), region = 16 }
  0x12   : > { %161 = sbr.rel (!%p2043_p3) target bundleno = 28 (0x1c), region = 20  ;;  %s163_s24 = sand.u32 (%p2043_p3), 1, %s1971_s13  }
  0x13   : > { %s1860_s25 = smul.u32 (%p2043_p3), 12, %s1979_s15  ;;  %s1761_s26 = sshll.u32 (%p2043_p3), %s163_s24, 5 }
  0x14   : > { %s165_s30 = scalar_lea.vmem (%p2043_p3), [#allocation6], %s1761_s26 }
  0x15   : > { %s171_s29 = scalar_lea.vmem (%p2043_p3), %s2301_s0, %s1860_s25 }
  0x16   : > { %v187_v0 = vld [vmem:[%s171_s29] sm:$0xf] (%p2043_p3)  ;;  %v189_v1 = vld [vmem:[%s171_s29 + $0x18] sm:$0xf] (%p2043_p3)  ;;  %v191_v2 = vld [vmem:[%s171_s29 + $0x30] sm:$0xf] (%p2043_p3) }
  0x17   : > { %188 = vst [vmem:[%s165_s30] sm:$0xf] (%p2043_p3), %v187_v0  ;;  %190 = vst [vmem:[%s165_s30 + $0x4] sm:$0xf] (%p2043_p3), %v189_v1  ;;  %v193_v3 = vld [vmem:[%s171_s29 + $0x48] sm:$0xf] (%p2043_p3) }
  0x18   : > { %192 = vst [vmem:[%s165_s30 + $0x8] sm:$0xf] (%p2043_p3), %v191_v2  ;;  %v195_v4 = vld [vmem:[%s171_s29 + $0x60] sm:$0xf] (%p2043_p3)  ;;  %v197_v5 = vld [vmem:[%s171_s29 + $0x78] sm:$0xf] (%p2043_p3) }
  0x19   : > { %194 = vst [vmem:[%s165_s30 + $0xc] sm:$0xf] %v193_v3  ;;  %196 = vst [vmem:[%s165_s30 + $0x10] sm:$0xf] %v195_v4  ;;  %v199_v6 = vld [vmem:[%s171_s29 + $0x90] sm:$0xf] }
  0x1a   : > { %198 = vst [vmem:[%s165_s30 + $0x14] sm:$0xf] %v197_v5  ;;  %v201_v7 = vld [vmem:[%s171_s29 + $0xa8] sm:$0xf]  ;;  %200 = vst [vmem:[%s165_s30 + $0x18] sm:$0xf] %v199_v6 }
  0x1b   : > { %202 = vst [vmem:[%s165_s30 + $0x1c] sm:$0xf] %v201_v7 }
  0x1c PF: > { %241 = sbr.rel (!%p2043_p3) target bundleno = 38 (0x26), region = 61  ;;  %s243_s4 = sand.u32 (%p2043_p3), 1, %s1971_s13  }
  0x1d   : > { %s1764_s5 = smul.u32 (%p2043_p3), 12, %s1979_s15  ;;  %s1763_s6 = sshll.u32 (%p2043_p3), %s243_s4, 5 }
  0x1e   : > { %s245_s10 = scalar_lea.vmem (%p2043_p3), [#allocation7], %s1763_s6 }
  0x1f   : > { %s1665_s9 = scalar_lea.vmem (%p2043_p3), %s2302_s1, %s1764_s5 }
  0x20   : > { %v1765_v8 = vld [vmem:[%s1665_s9 + $0x4] sm:$0xf] (%p2043_p3)  ;;  %v1766_v9 = vld [vmem:[%s1665_s9 + $0x1c] sm:$0xf] (%p2043_p3)  ;;  %v1767_v10 = vld [vmem:[%s1665_s9 + $0x34] sm:$0xf] (%p2043_p3) }
  0x21   : > { %269 = vst [vmem:[%s245_s10] sm:$0xf] (%p2043_p3), %v1765_v8  ;;  %271 = vst [vmem:[%s245_s10 + $0x4] sm:$0xf] (%p2043_p3), %v1766_v9  ;;  %v1768_v11 = vld [vmem:[%s1665_s9 + $0x4c] sm:$0xf] (%p2043_p3) }
  0x22   : > { %273 = vst [vmem:[%s245_s10 + $0x8] sm:$0xf] (%p2043_p3), %v1767_v10  ;;  %v1769_v12 = vld [vmem:[%s1665_s9 + $0x64] sm:$0xf] (%p2043_p3)  ;;  %v1770_v13 = vld [vmem:[%s1665_s9 + $0x7c] sm:$0xf] (%p2043_p3) }
  0x23   : > { %275 = vst [vmem:[%s245_s10 + $0xc] sm:$0xf] %v1768_v11  ;;  %277 = vst [vmem:[%s245_s10 + $0x10] sm:$0xf] %v1769_v12  ;;  %v1771_v14 = vld [vmem:[%s1665_s9 + $0x94] sm:$0xf] }
  0x24   : > { %279 = vst [vmem:[%s245_s10 + $0x14] sm:$0xf] %v1770_v13  ;;  %v1772_v15 = vld [vmem:[%s1665_s9 + $0xac] sm:$0xf]  ;;  %281 = vst [vmem:[%s245_s10 + $0x18] sm:$0xf] %v1771_v14 }
  0x25   : > { %283 = vst [vmem:[%s245_s10 + $0x1c] sm:$0xf] %v1772_v15 }
  0x26 PF: > { %322 = sbr.rel (!%p2043_p3) target bundleno = 48 (0x30), region = 102  ;;  %s324_s11 = sand.u32 (%p2043_p3), 1, %s1971_s13  }
  0x27   : > { %s1774_s18 = smul.u32 (%p2043_p3), 12, %s1979_s15  ;;  %s1773_s20 = sshll.u32 (%p2043_p3), %s324_s11, 5 }
  0x28   : > { %s326_s26 = scalar_lea.vmem (%p2043_p3), [#allocation8], %s1773_s20 }
  0x29   : > { %s1673_s25 = scalar_lea.vmem (%p2043_p3), %s2303_s2, %s1774_s18 }
  0x2a   : > { %v1775_v16 = vld [vmem:[%s1673_s25 + $0x8] sm:$0xf] (%p2043_p3)  ;;  %v1776_v17 = vld [vmem:[%s1673_s25 + $0x20] sm:$0xf] (%p2043_p3)  ;;  %v1777_v18 = vld [vmem:[%s1673_s25 + $0x38] sm:$0xf] (%p2043_p3) }
  0x2b   : > { %350 = vst [vmem:[%s326_s26] sm:$0xf] (%p2043_p3), %v1775_v16  ;;  %352 = vst [vmem:[%s326_s26 + $0x4] sm:$0xf] (%p2043_p3), %v1776_v17  ;;  %v1778_v19 = vld [vmem:[%s1673_s25 + $0x50] sm:$0xf] (%p2043_p3) }
  0x2c   : > { %354 = vst [vmem:[%s326_s26 + $0x8] sm:$0xf] (%p2043_p3), %v1777_v18  ;;  %v1779_v20 = vld [vmem:[%s1673_s25 + $0x68] sm:$0xf] (%p2043_p3)  ;;  %v1780_v21 = vld [vmem:[%s1673_s25 + $0x80] sm:$0xf] (%p2043_p3) }
  0x2d   : > { %356 = vst [vmem:[%s326_s26 + $0xc] sm:$0xf] %v1778_v19  ;;  %358 = vst [vmem:[%s326_s26 + $0x10] sm:$0xf] %v1779_v20  ;;  %v1781_v22 = vld [vmem:[%s1673_s25 + $0x98] sm:$0xf] }
  0x2e   : > { %360 = vst [vmem:[%s326_s26 + $0x14] sm:$0xf] %v1780_v21  ;;  %v1782_v23 = vld [vmem:[%s1673_s25 + $0xb0] sm:$0xf]  ;;  %362 = vst [vmem:[%s326_s26 + $0x18] sm:$0xf] %v1781_v22 }
  0x2f   : > { %364 = vst [vmem:[%s326_s26 + $0x1c] sm:$0xf] %v1782_v23 }
  0x30 PF: > { %p1783_p8 = scmp.ge.s32.totalorder %s1983_s16, 1  ;;  %p402_p9 = scmp.lt.s32.totalorder %s1983_s16, 3 }
  0x32   : > { %p403_p10 = pnand %p1783_p8, %p402_p9 }
  0x33   : > { %s409_s19 = sand.u32 (!%p403_p10), 1, %s1967_s12   ;;  %v473_v24 = vlaneseq (!%p403_p10)  ;;  %v1985_v25 = vmov (!%p403_p10), 0.0   ;;  %v1986_v26 = vmov (!%p403_p10), 1983009808   ;;  %vm537_vm0 = vcmask (!%p403_p10), 64512  }
  0x34   : > { %406 = sbr.rel (%p403_p10) target bundleno = 905 (0x389), region = 143  ;;  %1820 = vmatprep.subr.mxu0 (!%p403_p10), %v1985_v25  ;;  %s2083_s27 = sshll.u32 (!%p403_p10), %s409_s19, 5  ;;  %v471_v27 = vunpack.c.l.s4 (!%p403_p10), %v1986_v26  ;;  %1825 = vmatprep.subr.mxu1 (!%p403_p10), %v1985_v25  ;;  %v1987_v29 = vmov (!%p403_p10), 1934713408   ;;  %551 = vst.msk [vmem:[#allocation5] sm:$0xff] (!%p403_p10), %vm537_vm0, %v1985_v25  ;;  %552 = vst.msk [vmem:[#allocation5 + $0x8] sm:$0xff] (!%p403_p10), %vm537_vm0, %v1985_v25 }
  0x35   : > { %v474_v28 = vshrl.u32 (!%p403_p10), %v473_v24, 7  ;;  %v504_v30 = vunpack.c.l.s4 (!%p403_p10), %v1987_v29  ;;  %553 = vst.msk [vmem:[#allocation5 + $0x10] sm:$0xff] (!%p403_p10), %vm537_vm0, %v1985_v25  ;;  %554 = vst.msk [vmem:[#allocation5 + $0x18] sm:$0xff] (!%p403_p10), %vm537_vm0, %v1985_v25  ;;  %vm1988_vm1 = vmmov (!%p403_p10), 0   ;;  %s418_s12 = scalar_lea.vmem (!%p403_p10), [#allocation7], %s2083_s27  ;;  %s411_s28 = scalar_lea.vmem (!%p403_p10), [#allocation6], %s2083_s27 }
  0x36   : > { %1822 = vmatprep.mubr.msk.f32.mxu0 (!%p403_p10), %vm1988_vm1, %v1985_v25  ;;  %1827 = vmatprep.mubr.msk.f32.mxu1 (!%p403_p10), %vm1988_vm1, %v1985_v25  ;;  %v472_v31 = vunpack.c.0.s8 (!%p403_p10), %v471_v27  ;;  %v1909_v33 = vld [vmem:[%s418_s12] ss:$8 sps:$4 sm:$0xff] (!%p403_p10)   ;;  %v1910_v35 = vld [vmem:[%s418_s12 + $0x4] ss:$8 sps:$4 sm:$0xff] (!%p403_p10)   ;;  %v1911_v36 = vld [vmem:[%s418_s12 + $0x10] ss:$8 sps:$4 sm:$0xff] (!%p403_p10)  }
  0x37   : > { %v505_v34 = vunpack.c.0.s8 (!%p403_p10), %v504_v30  ;;  %v1912_v37 = vld [vmem:[%s418_s12 + $0x14] ss:$8 sps:$4 sm:$0xff] (!%p403_p10)   ;;  %v1913_v42 = vld [vmem:[%s411_s28] ss:$8 sps:$4 sm:$0xff] (!%p403_p10)   ;;  %v1914_v46 = vld [vmem:[%s411_s28 + $0x4] ss:$8 sps:$4 sm:$0xff] (!%p403_p10)  }
  0x38   : > { %v2099_v32 = vsub.s32 (!%p403_p10), %v472_v31, %v474_v28  ;;  %v1915_v47 = vld [vmem:[%s411_s28 + $0x10] ss:$8 sps:$4 sm:$0xff] (!%p403_p10)   ;;  %v1916_v48 = vld [vmem:[%s411_s28 + $0x14] ss:$8 sps:$4 sm:$0xff] (!%p403_p10)   ;;  %vm542_vm2 = vcmask (!%p403_p10), 7168   ;;  %v1989_v15 = vmov (!%p403_p10), -inf  }
  0x39   : > { %v2106_v43 = vsub.s32 (!%p403_p10), %v505_v34, %v474_v28  ;;  %543 = vst.msk [vmem:[#allocation3] sm:$0xff] (!%p403_p10), %vm542_vm2, %v1989_v15  ;;  %544 = vst.msk [vmem:[#allocation3 + $0x8] sm:$0xff] (!%p403_p10), %vm542_vm2, %v1989_v15  ;;  %v1990_v34 = vmov (!%p403_p10), 0   ;;  %s425_s29 = scalar_lea.vmem (!%p403_p10), [#allocation8], %s2083_s27  ;;  %vm1552_vm3 = vcmask (!%p403_p10), 60416   ;;  %s452_s30 = scalar_lea.vmem (!%p403_p10), [#allocation9], %s2083_s27 }
  0x3a   : > { %v570_v38 = vrot.slane (!%p403_p10), %v1909_v33, %v2099_v32  ;;  %v578_v39 = vrot.slane (!%p403_p10), %v1910_v35, %v2099_v32  ;;  %v586_v40 = vrot.slane (!%p403_p10), %v1911_v36, %v2099_v32  ;;  %v594_v41 = vrot.slane (!%p403_p10), %v1912_v37, %v2099_v32  ;;  %545 = vst.msk [vmem:[#allocation3 + $0x10] sm:$0xff] (!%p403_p10), %vm542_vm2, %v1989_v15 }
  0x3b   : > { %v476_v49 = vrot.slane %v1913_v42, %v2099_v32  ;;  %v484_v52 = vrot.slane %v1914_v46, %v2099_v32  ;;  %v492_v53 = vrot.slane %v1915_v47, %v2099_v32  ;;  %v500_v54 = vrot.slane %v1916_v48, %v2099_v32  ;;  %546 = vst.msk [vmem:[#allocation3 + $0x18] sm:$0xff] %vm542_vm2, %v1989_v15  ;;  %s1801_s4 = sshll.u32 (%p2050_p6), %s1975_s14, 2 }
  0x3c   : > { %v595_v44 = vcombine.low %v570_v38, %v578_v39  ;;  %v611_v45 = vcombine.low %v586_v40, %v594_v41  ;;  %v596_v1 = vcombine.high %v570_v38, %v578_v39  ;;  %v612_v2 = vcombine.high %v586_v40, %v594_v41  ;;  %547 = vst.msk [vmem:[#allocation4] sm:$0xff] %vm542_vm2, %v1985_v25  ;;  %s1572_s7 = scalar_lea.vmem (%p2050_p6), %s2304_s3, %s1801_s4 }
  0x3d   : > { %v501_v56 = vcombine.low %v476_v49, %v484_v52  ;;  %v502_v58 = vcombine.high %v476_v49, %v484_v52  ;;  %v517_v59 = vcombine.low %v492_v53, %v500_v54  ;;  %v518_v60 = vcombine.high %v492_v53, %v500_v54  ;;  %548 = vst.msk [vmem:[#allocation4 + $0x8] sm:$0xff] %vm542_vm2, %v1985_v25  ;;  %v1918_v52 = vld [vmem:[%s425_s29 + $0x4] ss:$8 sps:$4 sm:$0xff]   ;;  %v1919_v54 = vld [vmem:[%s425_s29 + $0x10] ss:$8 sps:$4 sm:$0xff]  }
  0x3e   : > { %v603_v50 = vrot.slane %v595_v44, %v2106_v43  ;;  %v619_v51 = vrot.slane %v611_v45, %v2106_v43  ;;  %v610_v7 = vrot.slane %v596_v1, %v2106_v43  ;;  %v626_v8 = vrot.slane %v612_v2, %v2106_v43  ;;  %549 = vst.msk [vmem:[#allocation4 + $0x10] sm:$0xff] %vm542_vm2, %v1985_v25 }
  0x3f   : > { %v509_v61 = vrot.slane %v501_v56, %v2106_v43  ;;  %v516_v62 = vrot.slane %v502_v58, %v2106_v43  ;;  %v525_v63 = vrot.slane %v517_v59, %v2106_v43  ;;  %v532_v0 = vrot.slane %v518_v60, %v2106_v43  ;;  %550 = vst.msk [vmem:[#allocation4 + $0x18] sm:$0xff] %vm542_vm2, %v1985_v25 }
  0x40   : > { %v627_v55 = vcombine.low %v603_v50, %v619_v51  ;;  %v628_v57 = vcombine.high %v603_v50, %v619_v51  ;;  %v629_v9 = vcombine.low %v610_v7, %v626_v8  ;;  %v630_v10 = vcombine.high %v610_v7, %v626_v8  ;;  %1907 = vset.pattern.permute.xlu0 %v1990_v34  ;;  %v2172_v35 = vld [vmem:[#allocation3] sm:$0xff]  ;;  %v2177_v38 = vld [vmem:[#allocation3 + $0x8] sm:$0xff] }
  0x41   : > { %v533_v3 = vcombine.low %v509_v61, %v525_v63  ;;  %v534_v4 = vcombine.high %v509_v61, %v525_v63  ;;  %v535_v5 = vcombine.low %v516_v62, %v532_v0  ;;  %v536_v6 = vcombine.high %v516_v62, %v532_v0  ;;  %1908 = vset.pattern.permute.xlu1 %v1990_v34  ;;  %v2179_v39 = vld [vmem:[#allocation3 + $0x10] sm:$0xff]  ;;  %v1917_v51 = vld [vmem:[%s425_s29] ss:$8 sps:$4 sm:$0xff]  }
  0x42   : > { %1821 = vmatpush3.xpose.msk.msra.mxu0 %vm537_vm0, %v627_v55  ;;  %1826 = vmatpush3.xpose.msk.msra.mxu1 %vm537_vm0, %v628_v57  ;;  %v2192_v46 = vld [vmem:[#allocation3 + $0x18] sm:$0xff]  ;;  %v646_v56 = vrot.slane %v1917_v51, %v2099_v32  ;;  %v654_v57 = vrot.slane %v1918_v52, %v2099_v32  ;;  %v662_v58 = vrot.slane %v1919_v54, %v2099_v32 }
  0x43   : > { %1830 = vmatprep.subr.mxu0 %v1985_v25  ;;  %1835 = vmatprep.subr.mxu1 %v1985_v25  ;;  %538 = vst.msk [vmem:[#allocation2] sm:$0xff] %vm537_vm0, %v533_v3  ;;  %539 = vst.msk [vmem:[#allocation2 + $0x8] sm:$0xff] %vm537_vm0, %v534_v4  ;;  %v1920_v55 = vld [vmem:[%s425_s29 + $0x14] ss:$8 sps:$4 sm:$0xff]  }
  0x44   : > { %540 = vst.msk [vmem:[#allocation2 + $0x10] sm:$0xff] %vm537_vm0, %v535_v5  ;;  %541 = vst.msk [vmem:[#allocation2 + $0x18] sm:$0xff] %vm537_vm0, %v536_v6  ;;  %v670_v59 = vrot.slane %v1920_v55, %v2099_v32  ;;  %v671_v60 = vcombine.low %v646_v56, %v654_v57  ;;  %v672_v2 = vcombine.high %v646_v56, %v654_v57 }
  0x46   : > { %v687_v61 = vcombine.low %v662_v58, %v670_v59  ;;  %v679_v62 = vrot.slane %v671_v60, %v2106_v43  ;;  %v688_v3 = vcombine.high %v662_v58, %v670_v59  ;;  %v686_v4 = vrot.slane %v672_v2, %v2106_v43  ;;  %v1114_v2 = vld [vmem:[#allocation5 + $0x8] sm:$0xff] }
  0x48   : > { %v695_v63 = vrot.slane %v687_v61, %v2106_v43  ;;  %v702_v5 = vrot.slane %v688_v3, %v2106_v43 }
  0x4a   : > { %v707_v11 = vld [vmem:[#allocation2] sm:$0xff]  ;;  %v708_v12 = vld [vmem:[#allocation2 + $0x8] sm:$0xff]  ;;  %v703_v0 = vcombine.low %v679_v62, %v695_v63  ;;  %v704_v1 = vcombine.high %v679_v62, %v695_v63  ;;  %v705_v6 = vcombine.low %v686_v4, %v702_v5  ;;  %v706_v7 = vcombine.high %v686_v4, %v702_v5 }
  0x4b   : > { %1823 = vmatmul.mubr.msk.f32.vlgmr.msra.gmra.mrb[0].mxu0 %vm537_vm0, %v707_v11  ;;  %1828 = vmatmul.mubr.msk.f32.vlgmr.msra.gmra.mrb[0].mxu1 %vm537_vm0, %v708_v12  ;;  %v709_v13 = vld [vmem:[#allocation2 + $0x10] sm:$0xff]  ;;  %v710_v14 = vld [vmem:[#allocation2 + $0x18] sm:$0xff]  ;;  %v1113_v63 = vld [vmem:[#allocation5] sm:$0xff] }
  0x4c   : > { %1831 = vmatpush3.xpose.msk.msra.mxu0 %vm537_vm0, %v629_v9  ;;  %1832 = vmatprep.mubr.msk.f32.mxu0 %vm1988_vm1, %v1985_v25 }
  0x4d   : > { %1836 = vmatpush3.xpose.msk.msra.mxu1 %vm537_vm0, %v630_v10  ;;  %1837 = vmatprep.mubr.msk.f32.mxu1 %vm1988_vm1, %v1985_v25 }
  0x4e   : > { %1840 = vmatprep.subr.mxu0 %v1985_v25  ;;  %1845 = vmatprep.subr.mxu1 %v1985_v25 }
  0x4f   : > { %1833 = vmatmul.mubr.msk.f32.vlgmr.msra.gmra.mrb[2].mxu0 %vm537_vm0, %v709_v13 }
  0x50   : > { %1838 = vmatmul.mubr.msk.f32.vlgmr.msra.gmra.mrb[2].mxu1 %vm537_vm0, %v710_v14  ;;  %1842 = vmatprep.mubr.msk.f32.mxu0 %vm1988_vm1, %v1985_v25 }
  0x51   : > { %1847 = vmatprep.mubr.msk.f32.mxu1 %vm1988_vm1, %v1985_v25  ;;  %1841 = vmatpush3.msra.mxu0 %v703_v0 }
  0x52   : > { %1846 = vmatpush3.msra.mxu1 %v704_v1  ;;  %1850 = vmatprep.subr.mxu0 %v1985_v25 }
  0x53   : > { %1855 = vmatprep.subr.mxu1 %v1985_v25 }
 0x11e   : > { %v784_v16 = vpop.f32.mrb[0].mxu0  ;;  %v860_v17 = vpop.f32.mrb[0].mxu1 }
 0x11f   : > { %v2156_v18 = vmul.f32 0.35355338, %v784_v16  ;;  %v1824_v19 = vpop.f32.mrb[1].mxu0  ;;  %v2158_v20 = vmul.f32 0.35355338, %v860_v17  ;;  %v1829_v21 = vpop.f32.mrb[1].mxu1 }
 0x121   : > { %v1024_v22 = vsel %vm537_vm0, %v2156_v18, -inf  ;;  %v1027_v26 = vsel %vm537_vm0, %v2158_v20, -inf }
 0x122   : > { %1025 = vmax.xlane.f32.xlu0 %v1024_v22  ;;  %v936_v23 = vpop.f32.mrb[2].mxu0 }
 0x123   : > { %v2162_v24 = vmul.f32 0.35355338, %v936_v23  ;;  %v1834_v27 = vpop.f32.mrb[3].mxu0  ;;  %v1012_v28 = vpop.f32.mrb[2].mxu1 }
 0x124   : > { %v2166_v29 = vmul.f32 0.35355338, %v1012_v28  ;;  %v1839_v30 = vpop.f32.mrb[3].mxu1 }
 0x125   : > { %v1030_v31 = vsel %vm537_vm0, %v2162_v24, -inf }
 0x126   : > { %1028 = vmax.xlane.f32.xlu0 %v1027_v26  ;;  %1031 = vmax.xlane.f32.xlu1 %v1030_v31  ;;  %v1033_v33 = vsel %vm537_vm0, %v2166_v29, -inf }
 0x12a   : > { %1034 = vmax.xlane.f32.xlu1 %v1033_v33 }
 0x1af   : > { %v1026_v36 = vpop.xlane.xlu0 %1025 }
 0x1b0   : > { %v2175_v37 = vmax.f32 %v2172_v35, %v1026_v36 }
 0x1b2   : > { %v1040_v40 = vsub.f32 %v2172_v35, %v2175_v37  ;;  %1441 = vst.msk [vmem:[#allocation3] sm:$0xff] %vm542_vm2, %v2175_v37  ;;  %1054 = vperm.xlu0 %1907, %v2175_v37   ;;  %v1084_v37 = vld [vmem:[#allocation4] sm:$0xff] }
 0x1b3   : > { %v1029_v41 = vpop.xlane.xlu0 %1028  ;;  %v1032_v42 = vpop.xlane.xlu1 %1031 }
 0x1b4   : > { %v2187_v44 = vmax.f32 %v2177_v38, %v1029_v41  ;;  %v2190_v45 = vmax.f32 %v2179_v39, %v1032_v42  ;;  %v1044_v30 = vmul.f32 1.442695, %v1040_v40  ;;  %v1085_v42 = vld [vmem:[#allocation4 + $0x8] sm:$0xff] }
 0x1b6   : > { %v1041_v47 = vsub.f32 %v2177_v38, %v2187_v44  ;;  %1442 = vst.msk [vmem:[#allocation3 + $0x8] sm:$0xff] %vm542_vm2, %v2187_v44  ;;  %1059 = vperm.xlu1 %1908, %v2187_v44   ;;  %v1042_v48 = vsub.f32 %v2179_v39, %v2190_v45  ;;  %1443 = vst.msk [vmem:[#allocation3 + $0x10] sm:$0xff] %vm542_vm2, %v2190_v45 }
 0x1b7   : > { %v1035_v49 = vpop.xlane.xlu1 %1034 }
 0x1b8   : > { %v2205_v50 = vmax.f32 %v2192_v46, %v1035_v49  ;;  %v1046_v28 = vmul.f32 1.442695, %v1041_v47  ;;  %v1048_v31 = vmul.f32 1.442695, %v1042_v48 }
 0x1ba   : > { %1064 = vperm.xlu1 %1908, %v2190_v45   ;;  %v1043_v53 = vsub.f32 %v2192_v46, %v2205_v50  ;;  %1444 = vst.msk [vmem:[#allocation3 + $0x18] sm:$0xff] %vm542_vm2, %v2205_v50  ;;  %v1086_v46 = vld [vmem:[#allocation4 + $0x10] sm:$0xff] }
 0x1bc   : > { %v1050_v33 = vmul.f32 1.442695, %v1043_v53 }
 0x1be   : > { %1069 = vperm.xlu1 %1908, %v2205_v50   ;;  %v1087_v50 = vld [vmem:[#allocation4 + $0x18] sm:$0xff] }
 0x231   : > { %v1055_v8 = vpop.permute.xlu0 %1054 }
 0x232   : > { %v1072_v9 = vsub.f32 %v2156_v18, %v1055_v8 }
 0x234   : > { %v1076_v10 = vmul.f32 1.442695, %v1072_v9  ;;  %v1115_v9 = vld [vmem:[#allocation5 + $0x10] sm:$0xff] }
 0x235   : > { %v1060_v11 = vpop.permute.xlu1 %1059 }
 0x236   : > { %1921 = vpow2.f32 %v1076_v10  ;;  %v1073_v12 = vsub.f32 %v2158_v20, %v1060_v11 }
 0x238   : > { %v1078_v13 = vmul.f32 1.442695, %v1073_v12 }
 0x239   : > { %v1065_v14 = vpop.permute.xlu1 %1064 }
 0x23a   : > { %1923 = vpow2.f32 %v1078_v13  ;;  %v1074_v15 = vsub.f32 %v2162_v24, %v1065_v14  ;;  %v1116_v14 = vld [vmem:[#allocation5 + $0x18] sm:$0xff] }
 0x23c   : > { %v1080_v16 = vmul.f32 1.442695, %v1074_v15 }
 0x23d   : > { %v1070_v17 = vpop.permute.xlu1 %1069 }
 0x23e   : > { %1925 = vpow2.f32 %v1080_v16  ;;  %v1075_v19 = vsub.f32 %v2166_v29, %v1070_v17 }
 0x240   : > { %v1922_v21 = vpop.eup %1921  ;;  %v1082_v22 = vmul.f32 1.442695, %v1075_v19 }
 0x241   : > { %1843 = vmatmul.mubr.msk.f32.vlgmr.msra.gmra.mrb[4].mxu0 %vm537_vm0, %v1922_v21  ;;  %v1092_v18 = vsel %vm537_vm0, %v1922_v21, 0.0 }
 0x242   : > { %1927 = vpow2.f32 %v1082_v22  ;;  %1093 = vadd.xlane.f32.xlu1 %v1092_v18  ;;  %1851 = vmatpush3.msra.mxu0 %v705_v6 }
 0x243   : > { %1852 = vmatprep.mubr.msk.f32.mxu0 %vm1988_vm1, %v1985_v25  ;;  %1929 = vpow2.f32 %v1046_v28 }
 0x244   : > { %v1924_v20 = vpop.eup %1923  ;;  %1931 = vpow2.f32 %v1044_v30 }
 0x245   : > { %1848 = vmatmul.mubr.msk.f32.vlgmr.msra.gmra.mrb[4].mxu1 %vm537_vm0, %v1924_v20  ;;  %v1095_v23 = vsel %vm537_vm0, %v1924_v20, 0.0  ;;  %1933 = vpow2.f32 %v1048_v31 }
 0x246   : > { %1096 = vadd.xlane.f32.xlu0 %v1095_v23  ;;  %1856 = vmatpush3.msra.mxu1 %v706_v7  ;;  %1935 = vpow2.f32 %v1050_v33 }
 0x247   : > { %1857 = vmatprep.mubr.msk.f32.mxu1 %vm1988_vm1, %v1985_v25 }
 0x248   : > { %v1926_v24 = vpop.eup %1925 }
 0x249   : > { %1853 = vmatmul.mubr.msk.f32.vlgmr.msra.gmra.mrb[6].mxu0 %vm537_vm0, %v1926_v24  ;;  %v1098_v26 = vsel %vm537_vm0, %v1926_v24, 0.0 }
 0x24a   : > { %1099 = vadd.xlane.f32.xlu1 %v1098_v26 }
 0x24c   : > { %v1928_v27 = vpop.eup %1927 }
 0x24d   : > { %1858 = vmatmul.mubr.msk.f32.vlgmr.msra.gmra.mrb[6].mxu1 %vm537_vm0, %v1928_v27  ;;  %v1101_v29 = vsel %vm537_vm0, %v1928_v27, 0.0  ;;  %v1930_v34 = vpop.eup %1929 }
 0x24e   : > { %1102 = vadd.xlane.f32.xlu1 %v1101_v29  ;;  %v1932_v36 = vpop.eup %1931  ;;  %v1089_v44 = vmul.f32 %v1930_v34, %v1085_v42 }
 0x24f   : > { %v1934_v38 = vpop.eup %1933  ;;  %v1088_v40 = vmul.f32 %v1932_v36, %v1084_v37 }
 0x250   : > { %v1936_v35 = vpop.eup %1935  ;;  %v1090_v48 = vmul.f32 %v1934_v38, %v1086_v46 }
 0x251   : > { %v1091_v53 = vmul.f32 %v1936_v35, %v1087_v50 }
 0x25c   : > { %1124 = vperm.xlu0 %1907, %v1930_v34  }
 0x25f   : > { %1119 = vperm.xlu1 %1908, %v1932_v36  }
 0x263   : > { %1129 = vperm.xlu1 %1908, %v1934_v38  }
 0x267   : > { %1134 = vperm.xlu1 %1908, %v1936_v35  }
 0x2cf   : > { %v1094_v41 = vpop.xlane.xlu1 %1093 }
 0x2d0   : > { %v1104_v39 = vadd.f32 %v1094_v41, %v1088_v40 }
 0x2d2   : > { %1109 = vst.msk [vmem:[#allocation4] sm:$0xff] %vm542_vm2, %v1104_v39 }
 0x2d3   : > { %v1097_v45 = vpop.xlane.xlu0 %1096 }
 0x2d4   : > { %v1105_v47 = vadd.f32 %v1097_v45, %v1089_v44 }
 0x2d6   : > { %1110 = vst.msk [vmem:[#allocation4 + $0x8] sm:$0xff] %vm542_vm2, %v1105_v47 }
 0x2d7   : > { %v1100_v49 = vpop.xlane.xlu1 %1099 }
 0x2d8   : > { %v1106_v51 = vadd.f32 %v1100_v49, %v1090_v48 }
 0x2d9   : > { %v1452_v52 = vld [vmem:[#allocation4] sm:$0xff] }
 0x2da   : > { %1111 = vst.msk [vmem:[#allocation4 + $0x10] sm:$0xff] %vm542_vm2, %v1106_v51  ;;  %1937 = vrcp.f32 %v1452_v52 }
 0x2db   : > { %v1103_v54 = vpop.xlane.xlu1 %1102  ;;  %v1125_v3 = vpop.permute.xlu0 %1124 }
 0x2dc   : > { %v1107_v55 = vadd.f32 %v1103_v54, %v1091_v53  ;;  %v1138_v8 = vmul.f32 %v1125_v3, %v1114_v2 }
 0x2dd   : > { %v1453_v56 = vld [vmem:[#allocation4 + $0x8] sm:$0xff] }
 0x2de   : > { %1112 = vst.msk [vmem:[#allocation4 + $0x18] sm:$0xff] %vm542_vm2, %v1107_v55  ;;  %1939 = vrcp.f32 %v1453_v56 }
 0x2df   : > { %v1120_v0 = vpop.permute.xlu1 %1119 }
 0x2e0   : > { %v1137_v1 = vmul.f32 %v1120_v0, %v1113_v63 }
 0x2e1   : > { %v1454_v57 = vld [vmem:[#allocation4 + $0x10] sm:$0xff] }
 0x2e2   : > { %1941 = vrcp.f32 %v1454_v57 }
 0x2e3   : > { %v1130_v7 = vpop.permute.xlu1 %1129 }
 0x2e4   : > { %v1938_v58 = vpop.eup %1937  ;;  %v1139_v13 = vmul.f32 %v1130_v7, %v1115_v9 }
 0x2e5   : > { %1462 = vperm.xlu1 %1908, %v1938_v58   ;;  %v1455_v59 = vld [vmem:[#allocation4 + $0x18] sm:$0xff] }
 0x2e6   : > { %1943 = vrcp.f32 %v1455_v59 }
 0x2e7   : > { %v1135_v15 = vpop.permute.xlu1 %1134 }
 0x2e8   : > { %v1940_v60 = vpop.eup %1939  ;;  %v1140_v21 = vmul.f32 %v1135_v15, %v1116_v14 }
 0x2e9   : > { %1467 = vperm.xlu0 %1907, %v1940_v60  }
 0x2ec   : > { %v1942_v61 = vpop.eup %1941 }
 0x2ed   : > { %1472 = vperm.xlu1 %1908, %v1942_v61  }
 0x2f0   : > { %v1944_v62 = vpop.eup %1943 }
 0x2f1   : > { %1477 = vperm.xlu0 %1907, %v1944_v62  }
 0x314   : > { %v1210_v4 = vpop.f32.mrb[4].mxu0 }
 0x315   : > { %v1433_v5 = vadd.f32 %v1210_v4, %v1137_v1  ;;  %v1844_v6 = vpop.f32.mrb[5].mxu0 }
 0x317   : > { %1437 = vst.msk [vmem:[#allocation5] sm:$0xff] %vm537_vm0, %v1433_v5 }
 0x318   : > { %v1283_v10 = vpop.f32.mrb[4].mxu1 }
 0x319   : > { %v1434_v11 = vadd.f32 %v1283_v10, %v1138_v8  ;;  %v1849_v12 = vpop.f32.mrb[5].mxu1 }
 0x31b   : > { %1438 = vst.msk [vmem:[#allocation5 + $0x8] sm:$0xff] %vm537_vm0, %v1434_v11 }
 0x31c   : > { %v1356_v16 = vpop.f32.mrb[6].mxu0 }
 0x31d   : > { %v1435_v17 = vadd.f32 %v1356_v16, %v1139_v13  ;;  %v1854_v19 = vpop.f32.mrb[7].mxu0 }
 0x31e   : > { %v1448_v29 = vld [vmem:[#allocation5] sm:$0xff] }
 0x31f   : > { %1439 = vst.msk [vmem:[#allocation5 + $0x10] sm:$0xff] %vm537_vm0, %v1435_v17 }
 0x320   : > { %v1429_v22 = vpop.f32.mrb[6].mxu1 }
 0x321   : > { %v1436_v18 = vadd.f32 %v1429_v22, %v1140_v21  ;;  %v1859_v20 = vpop.f32.mrb[7].mxu1 }
 0x322   : > { %v1449_v31 = vld [vmem:[#allocation5 + $0x8] sm:$0xff] }
 0x323   : > { %1440 = vst.msk [vmem:[#allocation5 + $0x18] sm:$0xff] %vm537_vm0, %v1436_v18 }
 0x326   : > { %v1450_v27 = vld [vmem:[#allocation5 + $0x10] sm:$0xff] }
 0x32a   : > { %v1451_v34 = vld [vmem:[#allocation5 + $0x18] sm:$0xff] }
 0x364   : > { %v1463_v23 = vpop.permute.xlu1 %1462 }
 0x365   : > { %v1480_v30 = vmul.f32 %v1463_v23, %v1448_v29 }
 0x368   : > { %v1468_v24 = vpop.permute.xlu0 %1467 }
 0x369   : > { %v1481_v36 = vmul.f32 %v1468_v24, %v1449_v31 }
 0x36c   : > { %v1473_v26 = vpop.permute.xlu1 %1472 }
 0x36d   : > { %v1482_v28 = vmul.f32 %v1473_v26, %v1450_v27 }
 0x36f   : > { %v1484_v38 = vcombine.low %v1480_v30, %v1482_v28  ;;  %v1485_v35 = vcombine.high %v1480_v30, %v1482_v28 }
 0x370   : > { %v1478_v33 = vpop.permute.xlu0 %1477 }
 0x371   : > { %v1483_v37 = vmul.f32 %v1478_v33, %v1451_v34  ;;  %v1492_v42 = vrot.slane %v1484_v38, %v2099_v32  ;;  %v1499_v39 = vrot.slane %v1485_v35, %v2099_v32 }
 0x373   : > { %v1500_v40 = vcombine.low %v1481_v36, %v1483_v37  ;;  %v1501_v41 = vcombine.high %v1481_v36, %v1483_v37 }
 0x375   : > { %v1508_v44 = vrot.slane %v1500_v40, %v2099_v32  ;;  %v1515_v45 = vrot.slane %v1501_v41, %v2099_v32 }
 0x377   : > { %v1516_v46 = vcombine.low %v1492_v42, %v1508_v44  ;;  %v1517_v47 = vcombine.high %v1492_v42, %v1508_v44  ;;  %v1532_v48 = vcombine.low %v1499_v39, %v1515_v45  ;;  %v1533_v49 = vcombine.high %v1499_v39, %v1515_v45 }
 0x379   : > { %v1524_v50 = vrot.slane %v1516_v46, %v2106_v43  ;;  %v1531_v51 = vrot.slane %v1517_v47, %v2106_v43  ;;  %v1540_v52 = vrot.slane %v1532_v48, %v2106_v43  ;;  %v1547_v53 = vrot.slane %v1533_v49, %v2106_v43  ;;  %1567 = sbr.rel (!%p2050_p6) target bundleno = 905 (0x389), region = 167 }
 0x37b   : > { %v1548_v54 = vcombine.high %v1524_v50, %v1985_v25  ;;  %v1549_v55 = vcombine.high %v1531_v51, %v1985_v25  ;;  %v1550_v56 = vcombine.high %v1540_v52, %v1985_v25  ;;  %v1551_v32 = vcombine.high %v1547_v53, %v1985_v25  ;;  %1553 = vst.msk [vmem:[%s452_s30] sm:$0xf] %vm1552_vm3, %v1524_v50 }
 0x37c   : > { %1555 = vst.msk [vmem:[%s452_s30 + $0x8] sm:$0xf] %vm1552_vm3, %v1531_v51  ;;  %1557 = vst.msk [vmem:[%s452_s30 + $0x10] sm:$0xf] %vm1552_vm3, %v1540_v52 }
 0x37d   : > { %1559 = vst.msk [vmem:[%s452_s30 + $0x18] sm:$0xf] %vm1552_vm3, %v1547_v53  ;;  %1554 = vst.msk [vmem:[%s452_s30 + $0x4] sm:$0xf] %vm1552_vm3, %v1548_v54 }
 0x37e   : > { %1556 = vst.msk [vmem:[%s452_s30 + $0xc] sm:$0xf] %vm1552_vm3, %v1549_v55  ;;  %1558 = vst.msk [vmem:[%s452_s30 + $0x14] sm:$0xf] %vm1552_vm3, %v1550_v56 }
 0x37f   : > { %1560 = vst.msk [vmem:[%s452_s30 + $0x1c] sm:$0xf] %vm1552_vm3, %v1551_v32 }
 0x382   : > { %v1588_v25 = vld [vmem:[%s452_s30] sm:$0xf] }
 0x383   : > { %v1592_v57 = vld [vmem:[%s452_s30 + $0x8] sm:$0xf]  ;;  %v1596_v59 = vld [vmem:[%s452_s30 + $0x10] sm:$0xf]  ;;  %1589 = vst [vmem:[%s1572_s7] sm:$0xf] %v1588_v25 }
 0x384   : > { %v1590_v43 = vld [vmem:[%s452_s30 + $0x4] sm:$0xf]  ;;  %1593 = vst [vmem:[%s1572_s7 + $0x10] sm:$0xf] %v1592_v57  ;;  %1597 = vst [vmem:[%s1572_s7 + $0x20] sm:$0xf] %v1596_v59 }
 0x385   : > { %v1594_v58 = vld [vmem:[%s452_s30 + $0xc] sm:$0xf]  ;;  %1591 = vst [vmem:[%s1572_s7 + $0x8] sm:$0xf] %v1590_v43  ;;  %v1598_v60 = vld [vmem:[%s452_s30 + $0x14] sm:$0xf] }
 0x386   : > { %1595 = vst [vmem:[%s1572_s7 + $0x18] sm:$0xf] %v1594_v58  ;;  %v1600_v61 = vld [vmem:[%s452_s30 + $0x18] sm:$0xf]  ;;  %v1602_v62 = vld [vmem:[%s452_s30 + $0x1c] sm:$0xf] }
 0x387   : > { %1599 = vst [vmem:[%s1572_s7 + $0x28] sm:$0xf] %v1598_v60  ;;  %1601 = vst [vmem:[%s1572_s7 + $0x30] sm:$0xf] %v1600_v61 }
 0x388   : > { %1603 = vst [vmem:[%s1572_s7 + $0x38] sm:$0xf] %v1602_v62 }
 0x389 PF: > { %s13_s16 = sadd.s32 1, %s1983_s16   ;;  %s2307_s12 = smov %s1971_s13 }
 0x38a   : > { %p10_p11 = scmp.ge.s32.totalorder %s13_s16, 4   ;;  %s2308_s13 = smov %s2055_s23 }
 0x38b   : > { %s2309_s14 = smov %s1979_s15  ;;  %s2310_s15 = smov %s2312_s17 }
 0x38c   :  { %12 = sbr.rel (!%p10_p11) target bundleno = 3 (0x3), region = 255 }

// kernel: transformer_encoder_layer_qkv.9
= control target key start
LH: loop header
LB: loop body
LE: loop exit
PB: predicated region body
PF: predicated region fallthrough
CT: control target
= control target key end

     0   :  { %s357_s0 = inlined_call_operand.vmem [shape: f32[16,128], index: 0, kind: input, shape index: {}]   ;;  %s358_s1 = inlined_call_operand.vmem [shape: f32[128,32], index: 1, kind: input, shape index: {}]   ;;  %s359_s2 = inlined_call_operand.vmem [shape: f32[1,32], index: 2, kind: input, shape index: {}]   ;;  %s360_s3 = inlined_call_operand.vmem [shape: f32[16,32], index: 3, kind: input, shape index: {}]   ;;  %s361_s4 = inlined_call_operand.hbm [shape: f32[16,32], index: 4, kind: output, shape index: {}]  }
   0x1   :  { %v20_v0 = vld [vmem:[%s358_s1] sm:$0xff]  ;;  %v21_v1 = vld [vmem:[%s358_s1 + $0x8] sm:$0xff]  ;;  %v22_v2 = vld [vmem:[%s358_s1 + $0x10] sm:$0xff] }
   0x2   :  { %v195_v3 = vpack.c.bf16 %v21_v1, %v20_v0  ;;  %v23_v4 = vld [vmem:[%s358_s1 + $0x18] sm:$0xff]  ;;  %v24_v6 = vld [vmem:[%s358_s1 + $0x20] sm:$0xff]  ;;  %v25_v7 = vld [vmem:[%s358_s1 + $0x28] sm:$0xff] }
   0x3   :  { %v199_v5 = vpack.c.bf16 %v23_v4, %v22_v2  ;;  %v203_v8 = vpack.c.bf16 %v25_v7, %v24_v6  ;;  %v18_v9 = vld [vmem:[%s357_s0] sm:$0xff]  ;;  %v26_v10 = vld [vmem:[%s358_s1 + $0x30] sm:$0xff]  ;;  %v27_v11 = vld [vmem:[%s358_s1 + $0x38] sm:$0xff] }
   0x4   :  { %196 = vmatprep.subr.bf16.mxu0 %v195_v3  ;;  %192 = vmatprep.mubr.f32.mxu0 %v18_v9 }
   0x5   :  { %198 = vmatpush3.bf16.msra.mxu0 %v195_v3 }
   0x6   :  { %200 = vmatprep.subr.bf16.mxu0 %v199_v5 }
   0x7   :  { %9 = vsyncpa [#allocation3], 0  ;;  %v207_v12 = vpack.c.bf16 %v27_v11, %v26_v10  ;;  %v28_v13 = vld [vmem:[%s358_s1 + $0x40] sm:$0xff]  ;;  %v29_v14 = vld [vmem:[%s358_s1 + $0x48] sm:$0xff]  ;;  %vm122_vm0 = vcmask 261120  }
   0x8   :  { %v211_v15 = vpack.c.bf16 %v29_v14, %v28_v13  ;;  %v30_v16 = vld [vmem:[%s358_s1 + $0x50] sm:$0xff]  ;;  %v31_v17 = vld [vmem:[%s358_s1 + $0x58] sm:$0xff]  ;;  %v32_v19 = vld [vmem:[%s358_s1 + $0x60] sm:$0xff] }
   0x9   :  { %202 = vmatpush3.bf16.msra.mxu0 %v199_v5  ;;  %v215_v18 = vpack.c.bf16 %v31_v17, %v30_v16  ;;  %v33_v20 = vld [vmem:[%s358_s1 + $0x68] sm:$0xff]  ;;  %v34_v22 = vld [vmem:[%s358_s1 + $0x70] sm:$0xff]  ;;  %v35_v23 = vld [vmem:[%s358_s1 + $0x78] sm:$0xff]  ;;  %s254_s1 = smov [#allocation2]  }
   0xa   :  { %204 = vmatprep.subr.bf16.mxu0 %v203_v8  ;;  %v219_v21 = vpack.c.bf16 %v33_v20, %v32_v19  ;;  %v223_v24 = vpack.c.bf16 %v35_v23, %v34_v22  ;;  %v19_v25 = vld [vmem:[%s357_s0 + $0x8] sm:$0xff]  ;;  %v141_v26 = vld [vmem:[%s359_s2] ss:$0 sm:$0xff]  ;;  %s130_s29 = sshll.u32 %s254_s1, 4  ;;  %s131_s29 = int_to_ptr.vmem [resolvable:$true] %s130_s29 }
   0xb   :  { %v119_v28 = vld [vmem:[%s360_s3 + $0x8] sm:$0xff]  ;;  %v118_v31 = vld [vmem:[%s360_s3] sm:$0xff]  ;;  %s230_s0 = scalar_lea.vmem %s131_s29, 256  ;;  %p235_p1 = scmp.lt.s32.totalorder %s131_s29, %s131_s29 }
   0xc   :  { %p231_p0 = scmp.ne.s32.totalorder %s131_s29, %s230_s0  ;;  %p236_p2 = scmp.lt.s32.totalorder %s230_s0, %s230_s0 }
   0xd   :  { %206 = vmatpush3.bf16.msra.mxu0 %v203_v8 }
   0xe   :  { %208 = vmatprep.subr.bf16.mxu0 %v207_v12  ;;  %p237_p3 = por %p236_p2, %p235_p1 }
  0x10   :  { %p238_p4 = pnand %p237_p3, %p231_p0 }
  0x11   :  { %210 = vmatpush3.bf16.msra.mxu0 %v207_v12 }
  0x12   :  { %212 = vmatprep.subr.bf16.mxu0 %v211_v15 }
  0x15   :  { %214 = vmatpush3.bf16.msra.mxu0 %v211_v15 }
  0x16   :  { %216 = vmatprep.subr.bf16.mxu0 %v215_v18 }
  0x19   :  { %218 = vmatpush3.bf16.msra.mxu0 %v215_v18 }
  0x1a   :  { %220 = vmatprep.subr.bf16.mxu0 %v219_v21 }
  0x1d   :  { %222 = vmatpush3.bf16.msra.mxu0 %v219_v21 }
  0x1e   :  { %224 = vmatprep.subr.bf16.mxu0 %v223_v24 }
  0x21   :  { %226 = vmatpush3.bf16.msra.mxu0 %v223_v24 }
  0x24   :  { %193 = vmatmul.mubr.f32.vlgmr.msra.gmra.mrb[0].mxu0 %v19_v25 }
  0xf7   :  { %v194_v27 = vpop.f32.mrb[0].mxu0 }
  0xf8   :  { %v115_v29 = vadd.f32 %v194_v27, %v141_v26  ;;  %v109_v30 = vpop.f32.mrb[1].mxu0 }
  0xf9   :  { %v110_v32 = vadd.f32 %v141_v26, %v109_v30 }
  0xfa   :  { %v121_v33 = vadd.f32 %v119_v28, %v115_v29 }
  0xfb   :  { %v120_v34 = vadd.f32 %v118_v31, %v110_v32 }
  0xfc   :  { %124 = vst.msk [vmem:[#allocation2 + $0x8] sm:$0xff] %vm122_vm0, %v121_v33 }
  0xfd   :  { %123 = vst.msk [vmem:[#allocation2] sm:$0xff] %vm122_vm0, %v120_v34 }
  0xfe   :  { %241 = shalt.err (!%p238_p4)
}
  0xff   :  { %s242_s7 = scalar_lea.hbm %s361_s4, 256 }
 0x100   :  { %p243_p5 = scmp.ne.s32.totalorder %s361_s4, %s242_s7  ;;  %p246_p6 = scmp.lt.u32.totalorder %s242_s7, %s361_s4 }
 0x102   :  { %p248_p7 = pnand %p246_p6, %p243_p5 }
 0x104   :  { %251 = shalt.err (!%p248_p7)
}
 0x105   :  { %s255_s11 = smov 128   ;;  %s256_s12 = smov 8  }
 0x106   :  { %136 = dma.vmem_to_hbm [thread:$0]  %s131_s29, 256, %s361_s4, [#allocation3], %s255_s11, %s255_s11, %s256_s12  }
 0x107   :  { %252 = dma.done.wait [#allocation3], 256  }
 0x108   :  { %253 = vsyncadd [#allocation3], 4294967040 }
 0x109   :  { %140 = vsyncpa [#allocation3], 1 }

</bundles_post_ra>
